<compile_context>
chip_gen: v6e
topology: v6e:2x2x1
jax: 0.10.0
libtpu: 0.0.40
codegen_flags: <defaults>
</compile_context>

<pallas_src>
import math

import jax
import jax.numpy as jnp
from jax.experimental import pallas as pl
from jax.experimental.pallas import tpu as pltpu


# ----------------------------------------------------------------------------
# Fused kernel: wavefront stacked-LSTM recurrence + final Linear, VMEM-resident
# ----------------------------------------------------------------------------
def _make_kernel(n_layers: int):
    def kernel(*refs):
        x_ref = refs[0]                                   # (T, B, F) f32, time-major
        layer_refs = refs[1:1 + 2 * n_layers]             # (w_stacked, bias) per layer
        wc_ref = refs[1 + 2 * n_layers]                   # (H, C) bf16
        bc_ref = refs[2 + 2 * n_layers]                   # (1, C) f32
        o_ref = refs[3 + 2 * n_layers]                    # (B, C) f32

        T, B, _ = x_ref.shape
        H = wc_ref.shape[0]

        # Hoist the (tiny) weights once.  NOTE: at H >= 128 this holds 64+
        # vregs live across the unrolled trace and would spill; at that scale
        # load per step from VMEM and bound the unroll with lax.fori_loop.
        w = [layer_refs[2 * l][...] for l in range(n_layers)]       # (H+in, 4H) bf16
        b = [layer_refs[2 * l + 1][...] for l in range(n_layers)]   # (1, 4H)   f32

        h = [jnp.zeros((B, H), jnp.float32) for _ in range(n_layers)]
        c = [jnp.zeros((B, H), jnp.float32) for _ in range(n_layers)]

        def cell_step(l, x_in):
            """One LSTM cell step for layer l.  x_in: (B, in_dim) f32."""
            # Single fused MXU push: [h_{t-1} | input_t] @ [W_hh^T ; W_ih^T]
            lhs = jnp.concatenate([h[l], x_in], axis=-1).astype(jnp.bfloat16)
            gates = jnp.dot(lhs, w[l], preferred_element_type=jnp.float32) + b[l]
            # Gate columns pre-permuted in the wrapper to [i, f, o, g]:
            # one sigmoid over 3H lanes, one tanh over H lanes.
            ifo = jax.nn.sigmoid(gates[:, :3 * H])
            g_g = jnp.tanh(gates[:, 3 * H:])
            i_g = ifo[:, 0 * H:1 * H]
            f_g = ifo[:, 1 * H:2 * H]
            o_g = ifo[:, 2 * H:3 * H]
            c[l] = f_g * c[l] + i_g * g_g
            h[l] = o_g * jnp.tanh(c[l])

        # Wavefront over the (layer, time) diagonal.  pending[l] holds layer
        # l-1's output for the timestep layer l processes next (produced one
        # wave earlier).  Inter-layer dropout is training-only -> identity.
        pending = [None] * n_layers
        for s in range(T + n_layers - 1):
            new_pending = list(pending)
            for l in range(n_layers):
                t = s - l
                if 0 <= t < T:
                    x_in = x_ref[t] if l == 0 else pending[l]
                    cell_step(l, x_in)
                    if l + 1 < n_layers:
                        new_pending[l + 1] = h[l]
            pending = new_pending

        # Classifier on the last layer's final hidden state (== hidden[-1]).
        logits = jnp.dot(h[n_layers - 1].astype(jnp.bfloat16), wc_ref[...],
                         preferred_element_type=jnp.float32) + bc_ref[...]
        o_ref[...] = logits.astype(o_ref.dtype)

    return kernel


# ----------------------------------------------------------------------------
# Wrapper
# ----------------------------------------------------------------------------
def attention_model_forward(x, packed):
    """x: (B, T, F) batch_first (like PyTorch).  Returns (B, C) f32 logits."""
    B, T, F = x.shape
    layers = packed["layers"]
    n_layers = len(layers)
    H, C = packed["cls_w"].shape

    # Time-major so x_ref[t] is a clean, tile-aligned (B, F) slab in VMEM.
    x_tm = jnp.transpose(x, (1, 0, 2)).astype(jnp.float32)    # (T, B, F)

    inputs = [x_tm]
    in_specs = [pl.BlockSpec((T, B, F), lambda: (0, 0, 0))]
    for lp in layers:
        inputs += [lp["w"], lp["b"]]
        in_specs += [pl.BlockSpec(lp["w"].shape, lambda: (0, 0)),
                     pl.BlockSpec(lp["b"].shape, lambda: (0, 0))]
    inputs += [packed["cls_w"], packed["cls_b"]]
    in_specs += [pl.BlockSpec((H, C), lambda: (0, 0)),
                 pl.BlockSpec((1, C), lambda: (0, 0))]

    # TODO(synk): for large batch, add a leading grid axis over batch chunks
    # with dimension_semantics=("parallel",) so v7x's second TensorCore is used.
    return pl.pallas_call(
        _make_kernel(n_layers),
        out_shape=jax.ShapeDtypeStruct((B, C), jnp.float32),
        in_specs=in_specs,
        out_specs=pl.BlockSpec((B, C), lambda: (0, 0)),
        # Explicit scoped-VMEM ceiling: residency here is <1 MiB, but setting
        # it keeps the same code compiling on v5e (16 MiB default scoped) and
        # within v7x's 64 MiB physical VMEM if T/B/H are scaled up.
        compiler_params=pltpu.CompilerParams(vmem_limit_bytes=32 * 1024 * 1024),
    )(*inputs)


# ----------------------------------------------------------------------------
# Parameter init (PyTorch layout) + packing into the fused kernel layout
# ----------------------------------------------------------------------------
def init_torch_params(key, n_features, n_classes, n_hidden, n_layers):
    """Deterministic PyTorch-style params: U(-1/sqrt(H), 1/sqrt(H))."""
    bound = 1.0 / math.sqrt(n_hidden)
    lstm = []
    for layer in range(n_layers):
        in_dim = n_features if layer == 0 else n_hidden
        key, k1, k2, k3, k4 = jax.random.split(key, 5)
        lstm.append(dict(
            w_ih=jax.random.uniform(k1, (4 * n_hidden, in_dim), jnp.float32, -bound, bound),
            w_hh=jax.random.uniform(k2, (4 * n_hidden, n_hidden), jnp.float32, -bound, bound),
            b_ih=jax.random.uniform(k3, (4 * n_hidden,), jnp.float32, -bound, bound),
            b_hh=jax.random.uniform(k4, (4 * n_hidden,), jnp.float32, -bound, bound)))
    key, k1, k2 = jax.random.split(key, 3)
    cls = dict(w=jax.random.uniform(k1, (n_classes, n_hidden), jnp.float32, -bound, bound),
               b=jax.random.uniform(k2, (n_classes,), jnp.float32, -bound, bound))
    return dict(lstm=lstm, cls=cls)


def _reorder_gate_blocks(a, n_hidden, axis=0):
    """PyTorch gate-block order [i, f, g, o] -> kernel order [i, f, o, g]."""
    blk = [jax.lax.slice_in_dim(a, k * n_hidden, (k + 1) * n_hidden, axis=axis)
           for k in range(4)]
    i, f, g, o = blk
    return jnp.concatenate([i, f, o, g], axis=axis)


def pack_params(torch_like):
    """PyTorch-layout params -> fused, gate-permuted, bf16 kernel layout."""
    n_hidden = torch_like["lstm"][0]["w_hh"].shape[1]
    layers = []
    for lp in torch_like["lstm"]:
        w_hh = _reorder_gate_blocks(lp["w_hh"], n_hidden)                # (4H, H)
        w_ih = _reorder_gate_blocks(lp["w_ih"], n_hidden)                # (4H, in)
        bias = _reorder_gate_blocks(lp["b_ih"] + lp["b_hh"], n_hidden)   # (4H,)
        w_stacked = jnp.concatenate([w_hh.T, w_ih.T], axis=0)            # (H+in, 4H)
        layers.append(dict(w=w_stacked.astype(jnp.bfloat16),
                           b=bias.reshape(1, -1).astype(jnp.float32)))
    return dict(layers=layers,
                cls_w=torch_like["cls"]["w"].T.astype(jnp.bfloat16),     # (H, C)
                cls_b=torch_like["cls"]["b"].reshape(1, -1).astype(jnp.float32))


if __name__ == "__main__":
    # Small shapes consistent with the module's forward
    B, T, F = 2, 8, 8          # batch, seq len, n_features
    H, C, L = 32, 4, 3         # n_hidden, n_classes, n_layers

    key = jax.random.PRNGKey(0)
    key, xkey, pkey = jax.random.split(key, 3)
    x = jax.random.normal(xkey, (B, T, F), jnp.float32)
    packed = pack_params(init_torch_params(pkey, n_features=F, n_classes=C,
                                           n_hidden=H, n_layers=L))

    fwd = jax.jit(attention_model_forward)
    out = fwd(x, packed)
    jax.block_until_ready(out)
    assert out.shape == (B, C), out.shape
    print("KERNEL_OK")
</pallas_src>

<mosaic_0001>
module attributes {stable_mosaic.version = 11 : i64} {
  func.func @kernel(%arg0: memref<8x2x8xf32, #tpu.memory_space<vmem>>, %arg1: memref<40x128xbf16, #tpu.memory_space<vmem>>, %arg2: memref<1x128xf32, #tpu.memory_space<vmem>>, %arg3: memref<64x128xbf16, #tpu.memory_space<vmem>>, %arg4: memref<1x128xf32, #tpu.memory_space<vmem>>, %arg5: memref<64x128xbf16, #tpu.memory_space<vmem>>, %arg6: memref<1x128xf32, #tpu.memory_space<vmem>>, %arg7: memref<32x4xbf16, #tpu.memory_space<vmem>>, %arg8: memref<1x4xf32, #tpu.memory_space<vmem>>, %arg9: memref<2x4xf32, #tpu.memory_space<vmem>>) attributes {dimension_semantics = [], scalar_prefetch = 0 : i64, scratch_operands = 0 : i64, tpu.core_type = #tpu.core_type<tc>} {
    %c0 = arith.constant 0 : index
    %c0_0 = arith.constant 0 : index
    %0 = vector.load %arg1[%c0, %c0_0] : memref<40x128xbf16, #tpu.memory_space<vmem>>, vector<40x128xbf16>
    %c0_1 = arith.constant 0 : index
    %c0_2 = arith.constant 0 : index
    %1 = vector.load %arg3[%c0_1, %c0_2] : memref<64x128xbf16, #tpu.memory_space<vmem>>, vector<64x128xbf16>
    %c0_3 = arith.constant 0 : index
    %c0_4 = arith.constant 0 : index
    %2 = vector.load %arg5[%c0_3, %c0_4] : memref<64x128xbf16, #tpu.memory_space<vmem>>, vector<64x128xbf16>
    %c0_5 = arith.constant 0 : index
    %c0_6 = arith.constant 0 : index
    %3 = vector.load %arg2[%c0_5, %c0_6] : memref<1x128xf32, #tpu.memory_space<vmem>>, vector<1x128xf32>
    %c0_7 = arith.constant 0 : index
    %c0_8 = arith.constant 0 : index
    %4 = vector.load %arg4[%c0_7, %c0_8] : memref<1x128xf32, #tpu.memory_space<vmem>>, vector<1x128xf32>
    %c0_9 = arith.constant 0 : index
    %c0_10 = arith.constant 0 : index
    %5 = vector.load %arg6[%c0_9, %c0_10] : memref<1x128xf32, #tpu.memory_space<vmem>>, vector<1x128xf32>
    %cst = arith.constant 0.000000e+00 : f32
    %6 = vector.broadcast %cst : f32 to vector<2x32xf32>
    %cst_11 = arith.constant 0.000000e+00 : f32
    %7 = vector.broadcast %cst_11 : f32 to vector<2x32xf32>
    %cst_12 = arith.constant 0.000000e+00 : f32
    %8 = vector.broadcast %cst_12 : f32 to vector<2x32xf32>
    %cst_13 = arith.constant 0.000000e+00 : f32
    %9 = vector.broadcast %cst_13 : f32 to vector<2x32xf32>
    %cst_14 = arith.constant 0.000000e+00 : f32
    %10 = vector.broadcast %cst_14 : f32 to vector<2x32xf32>
    %cst_15 = arith.constant 0.000000e+00 : f32
    %11 = vector.broadcast %cst_15 : f32 to vector<2x32xf32>
    %c0_16 = arith.constant 0 : index
    %c0_17 = arith.constant 0 : index
    %c0_18 = arith.constant 0 : index
    %12 = vector.load %arg0[%c0_16, %c0_17, %c0_18] : memref<8x2x8xf32, #tpu.memory_space<vmem>>, vector<1x2x8xf32>
    %13 = vector.shape_cast %12 : vector<1x2x8xf32> to vector<2x8xf32>
    %14 = tpu.concatenate %6, %13 in 1 : vector<2x32xf32>, vector<2x8xf32> -> vector<2x40xf32>
    %15 = arith.truncf %14 : vector<2x40xf32> to vector<2x40xbf16>
    %cst_19 = arith.constant dense<0.000000e+00> : vector<2x128xf32>
    %16 = tpu.matmul %15, %0, %cst_19 {dimension_numbers = #tpu.dot_dimension_numbers<[1], [0], [0], [1], [0, 0, 1, 1], [], []>} : vector<2x40xbf16>, vector<40x128xbf16>, vector<2x128xf32> -> vector<2x128xf32>
    %17 = vector.broadcast %3 : vector<1x128xf32> to vector<2x128xf32>
    %18 = arith.addf %16, %17 : vector<2x128xf32>
    %19 = vector.extract_strided_slice %18 {offsets = [0, 0], sizes = [2, 96], strides = [1, 1]} : vector<2x128xf32> to vector<2x96xf32>
    %20 = arith.negf %19 : vector<2x96xf32>
    %21 = math.exp %20 : vector<2x96xf32>
    %cst_20 = arith.constant 1.000000e+00 : f32
    %22 = vector.broadcast %cst_20 : f32 to vector<2x96xf32>
    %23 = arith.addf %22, %21 : vector<2x96xf32>
    %24 = arith.divf %22, %23 : vector<2x96xf32>
    %25 = vector.extract_strided_slice %18 {offsets = [0, 96], sizes = [2, 32], strides = [1, 1]} : vector<2x128xf32> to vector<2x32xf32>
    %26 = math.tanh %25 : vector<2x32xf32>
    %27 = vector.extract_strided_slice %24 {offsets = [0, 0], sizes = [2, 32], strides = [1, 1]} : vector<2x96xf32> to vector<2x32xf32>
    %28 = vector.extract_strided_slice %24 {offsets = [0, 32], sizes = [2, 32], strides = [1, 1]} : vector<2x96xf32> to vector<2x32xf32>
    %29 = vector.extract_strided_slice %24 {offsets = [0, 64], sizes = [2, 32], strides = [1, 1]} : vector<2x96xf32> to vector<2x32xf32>
    %30 = arith.mulf %28, %9 : vector<2x32xf32>
    %31 = arith.mulf %27, %26 : vector<2x32xf32>
    %32 = arith.addf %30, %31 : vector<2x32xf32>
    %33 = math.tanh %32 : vector<2x32xf32>
    %34 = arith.mulf %29, %33 : vector<2x32xf32>
    %c1 = arith.constant 1 : index
    %c0_21 = arith.constant 0 : index
    %c0_22 = arith.constant 0 : index
    %35 = vector.load %arg0[%c1, %c0_21, %c0_22] : memref<8x2x8xf32, #tpu.memory_space<vmem>>, vector<1x2x8xf32>
    %36 = vector.shape_cast %35 : vector<1x2x8xf32> to vector<2x8xf32>
    %37 = tpu.concatenate %34, %36 in 1 : vector<2x32xf32>, vector<2x8xf32> -> vector<2x40xf32>
    %38 = arith.truncf %37 : vector<2x40xf32> to vector<2x40xbf16>
    %cst_23 = arith.constant dense<0.000000e+00> : vector<2x128xf32>
    %39 = tpu.matmul %38, %0, %cst_23 {dimension_numbers = #tpu.dot_dimension_numbers<[1], [0], [0], [1], [0, 0, 1, 1], [], []>} : vector<2x40xbf16>, vector<40x128xbf16>, vector<2x128xf32> -> vector<2x128xf32>
    %40 = vector.broadcast %3 : vector<1x128xf32> to vector<2x128xf32>
    %41 = arith.addf %39, %40 : vector<2x128xf32>
    %42 = vector.extract_strided_slice %41 {offsets = [0, 0], sizes = [2, 96], strides = [1, 1]} : vector<2x128xf32> to vector<2x96xf32>
    %43 = arith.negf %42 : vector<2x96xf32>
    %44 = math.exp %43 : vector<2x96xf32>
    %cst_24 = arith.constant 1.000000e+00 : f32
    %45 = vector.broadcast %cst_24 : f32 to vector<2x96xf32>
    %46 = arith.addf %45, %44 : vector<2x96xf32>
    %47 = arith.divf %45, %46 : vector<2x96xf32>
    %48 = vector.extract_strided_slice %41 {offsets = [0, 96], sizes = [2, 32], strides = [1, 1]} : vector<2x128xf32> to vector<2x32xf32>
    %49 = math.tanh %48 : vector<2x32xf32>
    %50 = vector.extract_strided_slice %47 {offsets = [0, 0], sizes = [2, 32], strides = [1, 1]} : vector<2x96xf32> to vector<2x32xf32>
    %51 = vector.extract_strided_slice %47 {offsets = [0, 32], sizes = [2, 32], strides = [1, 1]} : vector<2x96xf32> to vector<2x32xf32>
    %52 = vector.extract_strided_slice %47 {offsets = [0, 64], sizes = [2, 32], strides = [1, 1]} : vector<2x96xf32> to vector<2x32xf32>
    %53 = arith.mulf %51, %32 : vector<2x32xf32>
    %54 = arith.mulf %50, %49 : vector<2x32xf32>
    %55 = arith.addf %53, %54 : vector<2x32xf32>
    %56 = math.tanh %55 : vector<2x32xf32>
    %57 = arith.mulf %52, %56 : vector<2x32xf32>
    %58 = tpu.concatenate %7, %34 in 1 : vector<2x32xf32>, vector<2x32xf32> -> vector<2x64xf32>
    %59 = arith.truncf %58 : vector<2x64xf32> to vector<2x64xbf16>
    %cst_25 = arith.constant dense<0.000000e+00> : vector<2x128xf32>
    %60 = tpu.matmul %59, %1, %cst_25 {dimension_numbers = #tpu.dot_dimension_numbers<[1], [0], [0], [1], [0, 0, 1, 1], [], []>} : vector<2x64xbf16>, vector<64x128xbf16>, vector<2x128xf32> -> vector<2x128xf32>
    %61 = vector.broadcast %4 : vector<1x128xf32> to vector<2x128xf32>
    %62 = arith.addf %60, %61 : vector<2x128xf32>
    %63 = vector.extract_strided_slice %62 {offsets = [0, 0], sizes = [2, 96], strides = [1, 1]} : vector<2x128xf32> to vector<2x96xf32>
    %64 = arith.negf %63 : vector<2x96xf32>
    %65 = math.exp %64 : vector<2x96xf32>
    %cst_26 = arith.constant 1.000000e+00 : f32
    %66 = vector.broadcast %cst_26 : f32 to vector<2x96xf32>
    %67 = arith.addf %66, %65 : vector<2x96xf32>
    %68 = arith.divf %66, %67 : vector<2x96xf32>
    %69 = vector.extract_strided_slice %62 {offsets = [0, 96], sizes = [2, 32], strides = [1, 1]} : vector<2x128xf32> to vector<2x32xf32>
    %70 = math.tanh %69 : vector<2x32xf32>
    %71 = vector.extract_strided_slice %68 {offsets = [0, 0], sizes = [2, 32], strides = [1, 1]} : vector<2x96xf32> to vector<2x32xf32>
    %72 = vector.extract_strided_slice %68 {offsets = [0, 32], sizes = [2, 32], strides = [1, 1]} : vector<2x96xf32> to vector<2x32xf32>
    %73 = vector.extract_strided_slice %68 {offsets = [0, 64], sizes = [2, 32], strides = [1, 1]} : vector<2x96xf32> to vector<2x32xf32>
    %74 = arith.mulf %72, %10 : vector<2x32xf32>
    %75 = arith.mulf %71, %70 : vector<2x32xf32>
    %76 = arith.addf %74, %75 : vector<2x32xf32>
    %77 = math.tanh %76 : vector<2x32xf32>
    %78 = arith.mulf %73, %77 : vector<2x32xf32>
    %c2 = arith.constant 2 : index
    %c0_27 = arith.constant 0 : index
    %c0_28 = arith.constant 0 : index
    %79 = vector.load %arg0[%c2, %c0_27, %c0_28] : memref<8x2x8xf32, #tpu.memory_space<vmem>>, vector<1x2x8xf32>
    %80 = vector.shape_cast %79 : vector<1x2x8xf32> to vector<2x8xf32>
    %81 = tpu.concatenate %57, %80 in 1 : vector<2x32xf32>, vector<2x8xf32> -> vector<2x40xf32>
    %82 = arith.truncf %81 : vector<2x40xf32> to vector<2x40xbf16>
    %cst_29 = arith.constant dense<0.000000e+00> : vector<2x128xf32>
    %83 = tpu.matmul %82, %0, %cst_29 {dimension_numbers = #tpu.dot_dimension_numbers<[1], [0], [0], [1], [0, 0, 1, 1], [], []>} : vector<2x40xbf16>, vector<40x128xbf16>, vector<2x128xf32> -> vector<2x128xf32>
    %84 = vector.broadcast %3 : vector<1x128xf32> to vector<2x128xf32>
    %85 = arith.addf %83, %84 : vector<2x128xf32>
    %86 = vector.extract_strided_slice %85 {offsets = [0, 0], sizes = [2, 96], strides = [1, 1]} : vector<2x128xf32> to vector<2x96xf32>
    %87 = arith.negf %86 : vector<2x96xf32>
    %88 = math.exp %87 : vector<2x96xf32>
    %cst_30 = arith.constant 1.000000e+00 : f32
    %89 = vector.broadcast %cst_30 : f32 to vector<2x96xf32>
    %90 = arith.addf %89, %88 : vector<2x96xf32>
    %91 = arith.divf %89, %90 : vector<2x96xf32>
    %92 = vector.extract_strided_slice %85 {offsets = [0, 96], sizes = [2, 32], strides = [1, 1]} : vector<2x128xf32> to vector<2x32xf32>
    %93 = math.tanh %92 : vector<2x32xf32>
    %94 = vector.extract_strided_slice %91 {offsets = [0, 0], sizes = [2, 32], strides = [1, 1]} : vector<2x96xf32> to vector<2x32xf32>
    %95 = vector.extract_strided_slice %91 {offsets = [0, 32], sizes = [2, 32], strides = [1, 1]} : vector<2x96xf32> to vector<2x32xf32>
    %96 = vector.extract_strided_slice %91 {offsets = [0, 64], sizes = [2, 32], strides = [1, 1]} : vector<2x96xf32> to vector<2x32xf32>
    %97 = arith.mulf %95, %55 : vector<2x32xf32>
    %98 = arith.mulf %94, %93 : vector<2x32xf32>
    %99 = arith.addf %97, %98 : vector<2x32xf32>
    %100 = math.tanh %99 : vector<2x32xf32>
    %101 = arith.mulf %96, %100 : vector<2x32xf32>
    %102 = tpu.concatenate %78, %57 in 1 : vector<2x32xf32>, vector<2x32xf32> -> vector<2x64xf32>
    %103 = arith.truncf %102 : vector<2x64xf32> to vector<2x64xbf16>
    %cst_31 = arith.constant dense<0.000000e+00> : vector<2x128xf32>
    %104 = tpu.matmul %103, %1, %cst_31 {dimension_numbers = #tpu.dot_dimension_numbers<[1], [0], [0], [1], [0, 0, 1, 1], [], []>} : vector<2x64xbf16>, vector<64x128xbf16>, vector<2x128xf32> -> vector<2x128xf32>
    %105 = vector.broadcast %4 : vector<1x128xf32> to vector<2x128xf32>
    %106 = arith.addf %104, %105 : vector<2x128xf32>
    %107 = vector.extract_strided_slice %106 {offsets = [0, 0], sizes = [2, 96], strides = [1, 1]} : vector<2x128xf32> to vector<2x96xf32>
    %108 = arith.negf %107 : vector<2x96xf32>
    %109 = math.exp %108 : vector<2x96xf32>
    %cst_32 = arith.constant 1.000000e+00 : f32
    %110 = vector.broadcast %cst_32 : f32 to vector<2x96xf32>
    %111 = arith.addf %110, %109 : vector<2x96xf32>
    %112 = arith.divf %110, %111 : vector<2x96xf32>
    %113 = vector.extract_strided_slice %106 {offsets = [0, 96], sizes = [2, 32], strides = [1, 1]} : vector<2x128xf32> to vector<2x32xf32>
    %114 = math.tanh %113 : vector<2x32xf32>
    %115 = vector.extract_strided_slice %112 {offsets = [0, 0], sizes = [2, 32], strides = [1, 1]} : vector<2x96xf32> to vector<2x32xf32>
    %116 = vector.extract_strided_slice %112 {offsets = [0, 32], sizes = [2, 32], strides = [1, 1]} : vector<2x96xf32> to vector<2x32xf32>
    %117 = vector.extract_strided_slice %112 {offsets = [0, 64], sizes = [2, 32], strides = [1, 1]} : vector<2x96xf32> to vector<2x32xf32>
    %118 = arith.mulf %116, %76 : vector<2x32xf32>
    %119 = arith.mulf %115, %114 : vector<2x32xf32>
    %120 = arith.addf %118, %119 : vector<2x32xf32>
    %121 = math.tanh %120 : vector<2x32xf32>
    %122 = arith.mulf %117, %121 : vector<2x32xf32>
    %123 = tpu.concatenate %8, %78 in 1 : vector<2x32xf32>, vector<2x32xf32> -> vector<2x64xf32>
    %124 = arith.truncf %123 : vector<2x64xf32> to vector<2x64xbf16>
    %cst_33 = arith.constant dense<0.000000e+00> : vector<2x128xf32>
    %125 = tpu.matmul %124, %2, %cst_33 {dimension_numbers = #tpu.dot_dimension_numbers<[1], [0], [0], [1], [0, 0, 1, 1], [], []>} : vector<2x64xbf16>, vector<64x128xbf16>, vector<2x128xf32> -> vector<2x128xf32>
    %126 = vector.broadcast %5 : vector<1x128xf32> to vector<2x128xf32>
    %127 = arith.addf %125, %126 : vector<2x128xf32>
    %128 = vector.extract_strided_slice %127 {offsets = [0, 0], sizes = [2, 96], strides = [1, 1]} : vector<2x128xf32> to vector<2x96xf32>
    %129 = arith.negf %128 : vector<2x96xf32>
    %130 = math.exp %129 : vector<2x96xf32>
    %cst_34 = arith.constant 1.000000e+00 : f32
    %131 = vector.broadcast %cst_34 : f32 to vector<2x96xf32>
    %132 = arith.addf %131, %130 : vector<2x96xf32>
    %133 = arith.divf %131, %132 : vector<2x96xf32>
    %134 = vector.extract_strided_slice %127 {offsets = [0, 96], sizes = [2, 32], strides = [1, 1]} : vector<2x128xf32> to vector<2x32xf32>
    %135 = math.tanh %134 : vector<2x32xf32>
    %136 = vector.extract_strided_slice %133 {offsets = [0, 0], sizes = [2, 32], strides = [1, 1]} : vector<2x96xf32> to vector<2x32xf32>
    %137 = vector.extract_strided_slice %133 {offsets = [0, 32], sizes = [2, 32], strides = [1, 1]} : vector<2x96xf32> to vector<2x32xf32>
    %138 = vector.extract_strided_slice %133 {offsets = [0, 64], sizes = [2, 32], strides = [1, 1]} : vector<2x96xf32> to vector<2x32xf32>
    %139 = arith.mulf %137, %11 : vector<2x32xf32>
    %140 = arith.mulf %136, %135 : vector<2x32xf32>
    %141 = arith.addf %139, %140 : vector<2x32xf32>
    %142 = math.tanh %141 : vector<2x32xf32>
    %143 = arith.mulf %138, %142 : vector<2x32xf32>
    %c3 = arith.constant 3 : index
    %c0_35 = arith.constant 0 : index
    %c0_36 = arith.constant 0 : index
    %144 = vector.load %arg0[%c3, %c0_35, %c0_36] : memref<8x2x8xf32, #tpu.memory_space<vmem>>, vector<1x2x8xf32>
    %145 = vector.shape_cast %144 : vector<1x2x8xf32> to vector<2x8xf32>
    %146 = tpu.concatenate %101, %145 in 1 : vector<2x32xf32>, vector<2x8xf32> -> vector<2x40xf32>
    %147 = arith.truncf %146 : vector<2x40xf32> to vector<2x40xbf16>
    %cst_37 = arith.constant dense<0.000000e+00> : vector<2x128xf32>
    %148 = tpu.matmul %147, %0, %cst_37 {dimension_numbers = #tpu.dot_dimension_numbers<[1], [0], [0], [1], [0, 0, 1, 1], [], []>} : vector<2x40xbf16>, vector<40x128xbf16>, vector<2x128xf32> -> vector<2x128xf32>
    %149 = vector.broadcast %3 : vector<1x128xf32> to vector<2x128xf32>
    %150 = arith.addf %148, %149 : vector<2x128xf32>
    %151 = vector.extract_strided_slice %150 {offsets = [0, 0], sizes = [2, 96], strides = [1, 1]} : vector<2x128xf32> to vector<2x96xf32>
    %152 = arith.negf %151 : vector<2x96xf32>
    %153 = math.exp %152 : vector<2x96xf32>
    %cst_38 = arith.constant 1.000000e+00 : f32
    %154 = vector.broadcast %cst_38 : f32 to vector<2x96xf32>
    %155 = arith.addf %154, %153 : vector<2x96xf32>
    %156 = arith.divf %154, %155 : vector<2x96xf32>
    %157 = vector.extract_strided_slice %150 {offsets = [0, 96], sizes = [2, 32], strides = [1, 1]} : vector<2x128xf32> to vector<2x32xf32>
    %158 = math.tanh %157 : vector<2x32xf32>
    %159 = vector.extract_strided_slice %156 {offsets = [0, 0], sizes = [2, 32], strides = [1, 1]} : vector<2x96xf32> to vector<2x32xf32>
    %160 = vector.extract_strided_slice %156 {offsets = [0, 32], sizes = [2, 32], strides = [1, 1]} : vector<2x96xf32> to vector<2x32xf32>
    %161 = vector.extract_strided_slice %156 {offsets = [0, 64], sizes = [2, 32], strides = [1, 1]} : vector<2x96xf32> to vector<2x32xf32>
    %162 = arith.mulf %160, %99 : vector<2x32xf32>
    %163 = arith.mulf %159, %158 : vector<2x32xf32>
    %164 = arith.addf %162, %163 : vector<2x32xf32>
    %165 = math.tanh %164 : vector<2x32xf32>
    %166 = arith.mulf %161, %165 : vector<2x32xf32>
    %167 = tpu.concatenate %122, %101 in 1 : vector<2x32xf32>, vector<2x32xf32> -> vector<2x64xf32>
    %168 = arith.truncf %167 : vector<2x64xf32> to vector<2x64xbf16>
    %cst_39 = arith.constant dense<0.000000e+00> : vector<2x128xf32>
    %169 = tpu.matmul %168, %1, %cst_39 {dimension_numbers = #tpu.dot_dimension_numbers<[1], [0], [0], [1], [0, 0, 1, 1], [], []>} : vector<2x64xbf16>, vector<64x128xbf16>, vector<2x128xf32> -> vector<2x128xf32>
    %170 = vector.broadcast %4 : vector<1x128xf32> to vector<2x128xf32>
    %171 = arith.addf %169, %170 : vector<2x128xf32>
    %172 = vector.extract_strided_slice %171 {offsets = [0, 0], sizes = [2, 96], strides = [1, 1]} : vector<2x128xf32> to vector<2x96xf32>
    %173 = arith.negf %172 : vector<2x96xf32>
    %174 = math.exp %173 : vector<2x96xf32>
    %cst_40 = arith.constant 1.000000e+00 : f32
    %175 = vector.broadcast %cst_40 : f32 to vector<2x96xf32>
    %176 = arith.addf %175, %174 : vector<2x96xf32>
    %177 = arith.divf %175, %176 : vector<2x96xf32>
    %178 = vector.extract_strided_slice %171 {offsets = [0, 96], sizes = [2, 32], strides = [1, 1]} : vector<2x128xf32> to vector<2x32xf32>
    %179 = math.tanh %178 : vector<2x32xf32>
    %180 = vector.extract_strided_slice %177 {offsets = [0, 0], sizes = [2, 32], strides = [1, 1]} : vector<2x96xf32> to vector<2x32xf32>
    %181 = vector.extract_strided_slice %177 {offsets = [0, 32], sizes = [2, 32], strides = [1, 1]} : vector<2x96xf32> to vector<2x32xf32>
    %182 = vector.extract_strided_slice %177 {offsets = [0, 64], sizes = [2, 32], strides = [1, 1]} : vector<2x96xf32> to vector<2x32xf32>
    %183 = arith.mulf %181, %120 : vector<2x32xf32>
    %184 = arith.mulf %180, %179 : vector<2x32xf32>
    %185 = arith.addf %183, %184 : vector<2x32xf32>
    %186 = math.tanh %185 : vector<2x32xf32>
    %187 = arith.mulf %182, %186 : vector<2x32xf32>
    %188 = tpu.concatenate %143, %122 in 1 : vector<2x32xf32>, vector<2x32xf32> -> vector<2x64xf32>
    %189 = arith.truncf %188 : vector<2x64xf32> to vector<2x64xbf16>
    %cst_41 = arith.constant dense<0.000000e+00> : vector<2x128xf32>
    %190 = tpu.matmul %189, %2, %cst_41 {dimension_numbers = #tpu.dot_dimension_numbers<[1], [0], [0], [1], [0, 0, 1, 1], [], []>} : vector<2x64xbf16>, vector<64x128xbf16>, vector<2x128xf32> -> vector<2x128xf32>
    %191 = vector.broadcast %5 : vector<1x128xf32> to vector<2x128xf32>
    %192 = arith.addf %190, %191 : vector<2x128xf32>
    %193 = vector.extract_strided_slice %192 {offsets = [0, 0], sizes = [2, 96], strides = [1, 1]} : vector<2x128xf32> to vector<2x96xf32>
    %194 = arith.negf %193 : vector<2x96xf32>
    %195 = math.exp %194 : vector<2x96xf32>
    %cst_42 = arith.constant 1.000000e+00 : f32
    %196 = vector.broadcast %cst_42 : f32 to vector<2x96xf32>
    %197 = arith.addf %196, %195 : vector<2x96xf32>
    %198 = arith.divf %196, %197 : vector<2x96xf32>
    %199 = vector.extract_strided_slice %192 {offsets = [0, 96], sizes = [2, 32], strides = [1, 1]} : vector<2x128xf32> to vector<2x32xf32>
    %200 = math.tanh %199 : vector<2x32xf32>
    %201 = vector.extract_strided_slice %198 {offsets = [0, 0], sizes = [2, 32], strides = [1, 1]} : vector<2x96xf32> to vector<2x32xf32>
    %202 = vector.extract_strided_slice %198 {offsets = [0, 32], sizes = [2, 32], strides = [1, 1]} : vector<2x96xf32> to vector<2x32xf32>
    %203 = vector.extract_strided_slice %198 {offsets = [0, 64], sizes = [2, 32], strides = [1, 1]} : vector<2x96xf32> to vector<2x32xf32>
    %204 = arith.mulf %202, %141 : vector<2x32xf32>
    %205 = arith.mulf %201, %200 : vector<2x32xf32>
    %206 = arith.addf %204, %205 : vector<2x32xf32>
    %207 = math.tanh %206 : vector<2x32xf32>
    %208 = arith.mulf %203, %207 : vector<2x32xf32>
    %c4 = arith.constant 4 : index
    %c0_43 = arith.constant 0 : index
    %c0_44 = arith.constant 0 : index
    %209 = vector.load %arg0[%c4, %c0_43, %c0_44] : memref<8x2x8xf32, #tpu.memory_space<vmem>>, vector<1x2x8xf32>
    %210 = vector.shape_cast %209 : vector<1x2x8xf32> to vector<2x8xf32>
    %211 = tpu.concatenate %166, %210 in 1 : vector<2x32xf32>, vector<2x8xf32> -> vector<2x40xf32>
    %212 = arith.truncf %211 : vector<2x40xf32> to vector<2x40xbf16>
    %cst_45 = arith.constant dense<0.000000e+00> : vector<2x128xf32>
    %213 = tpu.matmul %212, %0, %cst_45 {dimension_numbers = #tpu.dot_dimension_numbers<[1], [0], [0], [1], [0, 0, 1, 1], [], []>} : vector<2x40xbf16>, vector<40x128xbf16>, vector<2x128xf32> -> vector<2x128xf32>
    %214 = vector.broadcast %3 : vector<1x128xf32> to vector<2x128xf32>
    %215 = arith.addf %213, %214 : vector<2x128xf32>
    %216 = vector.extract_strided_slice %215 {offsets = [0, 0], sizes = [2, 96], strides = [1, 1]} : vector<2x128xf32> to vector<2x96xf32>
    %217 = arith.negf %216 : vector<2x96xf32>
    %218 = math.exp %217 : vector<2x96xf32>
    %cst_46 = arith.constant 1.000000e+00 : f32
    %219 = vector.broadcast %cst_46 : f32 to vector<2x96xf32>
    %220 = arith.addf %219, %218 : vector<2x96xf32>
    %221 = arith.divf %219, %220 : vector<2x96xf32>
    %222 = vector.extract_strided_slice %215 {offsets = [0, 96], sizes = [2, 32], strides = [1, 1]} : vector<2x128xf32> to vector<2x32xf32>
    %223 = math.tanh %222 : vector<2x32xf32>
    %224 = vector.extract_strided_slice %221 {offsets = [0, 0], sizes = [2, 32], strides = [1, 1]} : vector<2x96xf32> to vector<2x32xf32>
    %225 = vector.extract_strided_slice %221 {offsets = [0, 32], sizes = [2, 32], strides = [1, 1]} : vector<2x96xf32> to vector<2x32xf32>
    %226 = vector.extract_strided_slice %221 {offsets = [0, 64], sizes = [2, 32], strides = [1, 1]} : vector<2x96xf32> to vector<2x32xf32>
    %227 = arith.mulf %225, %164 : vector<2x32xf32>
    %228 = arith.mulf %224, %223 : vector<2x32xf32>
    %229 = arith.addf %227, %228 : vector<2x32xf32>
    %230 = math.tanh %229 : vector<2x32xf32>
    %231 = arith.mulf %226, %230 : vector<2x32xf32>
    %232 = tpu.concatenate %187, %166 in 1 : vector<2x32xf32>, vector<2x32xf32> -> vector<2x64xf32>
    %233 = arith.truncf %232 : vector<2x64xf32> to vector<2x64xbf16>
    %cst_47 = arith.constant dense<0.000000e+00> : vector<2x128xf32>
    %234 = tpu.matmul %233, %1, %cst_47 {dimension_numbers = #tpu.dot_dimension_numbers<[1], [0], [0], [1], [0, 0, 1, 1], [], []>} : vector<2x64xbf16>, vector<64x128xbf16>, vector<2x128xf32> -> vector<2x128xf32>
    %235 = vector.broadcast %4 : vector<1x128xf32> to vector<2x128xf32>
    %236 = arith.addf %234, %235 : vector<2x128xf32>
    %237 = vector.extract_strided_slice %236 {offsets = [0, 0], sizes = [2, 96], strides = [1, 1]} : vector<2x128xf32> to vector<2x96xf32>
    %238 = arith.negf %237 : vector<2x96xf32>
    %239 = math.exp %238 : vector<2x96xf32>
    %cst_48 = arith.constant 1.000000e+00 : f32
    %240 = vector.broadcast %cst_48 : f32 to vector<2x96xf32>
    %241 = arith.addf %240, %239 : vector<2x96xf32>
    %242 = arith.divf %240, %241 : vector<2x96xf32>
    %243 = vector.extract_strided_slice %236 {offsets = [0, 96], sizes = [2, 32], strides = [1, 1]} : vector<2x128xf32> to vector<2x32xf32>
    %244 = math.tanh %243 : vector<2x32xf32>
    %245 = vector.extract_strided_slice %242 {offsets = [0, 0], sizes = [2, 32], strides = [1, 1]} : vector<2x96xf32> to vector<2x32xf32>
    %246 = vector.extract_strided_slice %242 {offsets = [0, 32], sizes = [2, 32], strides = [1, 1]} : vector<2x96xf32> to vector<2x32xf32>
    %247 = vector.extract_strided_slice %242 {offsets = [0, 64], sizes = [2, 32], strides = [1, 1]} : vector<2x96xf32> to vector<2x32xf32>
    %248 = arith.mulf %246, %185 : vector<2x32xf32>
    %249 = arith.mulf %245, %244 : vector<2x32xf32>
    %250 = arith.addf %248, %249 : vector<2x32xf32>
    %251 = math.tanh %250 : vector<2x32xf32>
    %252 = arith.mulf %247, %251 : vector<2x32xf32>
    %253 = tpu.concatenate %208, %187 in 1 : vector<2x32xf32>, vector<2x32xf32> -> vector<2x64xf32>
    %254 = arith.truncf %253 : vector<2x64xf32> to vector<2x64xbf16>
    %cst_49 = arith.constant dense<0.000000e+00> : vector<2x128xf32>
    %255 = tpu.matmul %254, %2, %cst_49 {dimension_numbers = #tpu.dot_dimension_numbers<[1], [0], [0], [1], [0, 0, 1, 1], [], []>} : vector<2x64xbf16>, vector<64x128xbf16>, vector<2x128xf32> -> vector<2x128xf32>
    %256 = vector.broadcast %5 : vector<1x128xf32> to vector<2x128xf32>
    %257 = arith.addf %255, %256 : vector<2x128xf32>
    %258 = vector.extract_strided_slice %257 {offsets = [0, 0], sizes = [2, 96], strides = [1, 1]} : vector<2x128xf32> to vector<2x96xf32>
    %259 = arith.negf %258 : vector<2x96xf32>
    %260 = math.exp %259 : vector<2x96xf32>
    %cst_50 = arith.constant 1.000000e+00 : f32
    %261 = vector.broadcast %cst_50 : f32 to vector<2x96xf32>
    %262 = arith.addf %261, %260 : vector<2x96xf32>
    %263 = arith.divf %261, %262 : vector<2x96xf32>
    %264 = vector.extract_strided_slice %257 {offsets = [0, 96], sizes = [2, 32], strides = [1, 1]} : vector<2x128xf32> to vector<2x32xf32>
    %265 = math.tanh %264 : vector<2x32xf32>
    %266 = vector.extract_strided_slice %263 {offsets = [0, 0], sizes = [2, 32], strides = [1, 1]} : vector<2x96xf32> to vector<2x32xf32>
    %267 = vector.extract_strided_slice %263 {offsets = [0, 32], sizes = [2, 32], strides = [1, 1]} : vector<2x96xf32> to vector<2x32xf32>
    %268 = vector.extract_strided_slice %263 {offsets = [0, 64], sizes = [2, 32], strides = [1, 1]} : vector<2x96xf32> to vector<2x32xf32>
    %269 = arith.mulf %267, %206 : vector<2x32xf32>
    %270 = arith.mulf %266, %265 : vector<2x32xf32>
    %271 = arith.addf %269, %270 : vector<2x32xf32>
    %272 = math.tanh %271 : vector<2x32xf32>
    %273 = arith.mulf %268, %272 : vector<2x32xf32>
    %c5 = arith.constant 5 : index
    %c0_51 = arith.constant 0 : index
    %c0_52 = arith.constant 0 : index
    %274 = vector.load %arg0[%c5, %c0_51, %c0_52] : memref<8x2x8xf32, #tpu.memory_space<vmem>>, vector<1x2x8xf32>
    %275 = vector.shape_cast %274 : vector<1x2x8xf32> to vector<2x8xf32>
    %276 = tpu.concatenate %231, %275 in 1 : vector<2x32xf32>, vector<2x8xf32> -> vector<2x40xf32>
    %277 = arith.truncf %276 : vector<2x40xf32> to vector<2x40xbf16>
    %cst_53 = arith.constant dense<0.000000e+00> : vector<2x128xf32>
    %278 = tpu.matmul %277, %0, %cst_53 {dimension_numbers = #tpu.dot_dimension_numbers<[1], [0], [0], [1], [0, 0, 1, 1], [], []>} : vector<2x40xbf16>, vector<40x128xbf16>, vector<2x128xf32> -> vector<2x128xf32>
    %279 = vector.broadcast %3 : vector<1x128xf32> to vector<2x128xf32>
    %280 = arith.addf %278, %279 : vector<2x128xf32>
    %281 = vector.extract_strided_slice %280 {offsets = [0, 0], sizes = [2, 96], strides = [1, 1]} : vector<2x128xf32> to vector<2x96xf32>
    %282 = arith.negf %281 : vector<2x96xf32>
    %283 = math.exp %282 : vector<2x96xf32>
    %cst_54 = arith.constant 1.000000e+00 : f32
    %284 = vector.broadcast %cst_54 : f32 to vector<2x96xf32>
    %285 = arith.addf %284, %283 : vector<2x96xf32>
    %286 = arith.divf %284, %285 : vector<2x96xf32>
    %287 = vector.extract_strided_slice %280 {offsets = [0, 96], sizes = [2, 32], strides = [1, 1]} : vector<2x128xf32> to vector<2x32xf32>
    %288 = math.tanh %287 : vector<2x32xf32>
    %289 = vector.extract_strided_slice %286 {offsets = [0, 0], sizes = [2, 32], strides = [1, 1]} : vector<2x96xf32> to vector<2x32xf32>
    %290 = vector.extract_strided_slice %286 {offsets = [0, 32], sizes = [2, 32], strides = [1, 1]} : vector<2x96xf32> to vector<2x32xf32>
    %291 = vector.extract_strided_slice %286 {offsets = [0, 64], sizes = [2, 32], strides = [1, 1]} : vector<2x96xf32> to vector<2x32xf32>
    %292 = arith.mulf %290, %229 : vector<2x32xf32>
    %293 = arith.mulf %289, %288 : vector<2x32xf32>
    %294 = arith.addf %292, %293 : vector<2x32xf32>
    %295 = math.tanh %294 : vector<2x32xf32>
    %296 = arith.mulf %291, %295 : vector<2x32xf32>
    %297 = tpu.concatenate %252, %231 in 1 : vector<2x32xf32>, vector<2x32xf32> -> vector<2x64xf32>
    %298 = arith.truncf %297 : vector<2x64xf32> to vector<2x64xbf16>
    %cst_55 = arith.constant dense<0.000000e+00> : vector<2x128xf32>
    %299 = tpu.matmul %298, %1, %cst_55 {dimension_numbers = #tpu.dot_dimension_numbers<[1], [0], [0], [1], [0, 0, 1, 1], [], []>} : vector<2x64xbf16>, vector<64x128xbf16>, vector<2x128xf32> -> vector<2x128xf32>
    %300 = vector.broadcast %4 : vector<1x128xf32> to vector<2x128xf32>
    %301 = arith.addf %299, %300 : vector<2x128xf32>
    %302 = vector.extract_strided_slice %301 {offsets = [0, 0], sizes = [2, 96], strides = [1, 1]} : vector<2x128xf32> to vector<2x96xf32>
    %303 = arith.negf %302 : vector<2x96xf32>
    %304 = math.exp %303 : vector<2x96xf32>
    %cst_56 = arith.constant 1.000000e+00 : f32
    %305 = vector.broadcast %cst_56 : f32 to vector<2x96xf32>
    %306 = arith.addf %305, %304 : vector<2x96xf32>
    %307 = arith.divf %305, %306 : vector<2x96xf32>
    %308 = vector.extract_strided_slice %301 {offsets = [0, 96], sizes = [2, 32], strides = [1, 1]} : vector<2x128xf32> to vector<2x32xf32>
    %309 = math.tanh %308 : vector<2x32xf32>
    %310 = vector.extract_strided_slice %307 {offsets = [0, 0], sizes = [2, 32], strides = [1, 1]} : vector<2x96xf32> to vector<2x32xf32>
    %311 = vector.extract_strided_slice %307 {offsets = [0, 32], sizes = [2, 32], strides = [1, 1]} : vector<2x96xf32> to vector<2x32xf32>
    %312 = vector.extract_strided_slice %307 {offsets = [0, 64], sizes = [2, 32], strides = [1, 1]} : vector<2x96xf32> to vector<2x32xf32>
    %313 = arith.mulf %311, %250 : vector<2x32xf32>
    %314 = arith.mulf %310, %309 : vector<2x32xf32>
    %315 = arith.addf %313, %314 : vector<2x32xf32>
    %316 = math.tanh %315 : vector<2x32xf32>
    %317 = arith.mulf %312, %316 : vector<2x32xf32>
    %318 = tpu.concatenate %273, %252 in 1 : vector<2x32xf32>, vector<2x32xf32> -> vector<2x64xf32>
    %319 = arith.truncf %318 : vector<2x64xf32> to vector<2x64xbf16>
    %cst_57 = arith.constant dense<0.000000e+00> : vector<2x128xf32>
    %320 = tpu.matmul %319, %2, %cst_57 {dimension_numbers = #tpu.dot_dimension_numbers<[1], [0], [0], [1], [0, 0, 1, 1], [], []>} : vector<2x64xbf16>, vector<64x128xbf16>, vector<2x128xf32> -> vector<2x128xf32>
    %321 = vector.broadcast %5 : vector<1x128xf32> to vector<2x128xf32>
    %322 = arith.addf %320, %321 : vector<2x128xf32>
    %323 = vector.extract_strided_slice %322 {offsets = [0, 0], sizes = [2, 96], strides = [1, 1]} : vector<2x128xf32> to vector<2x96xf32>
    %324 = arith.negf %323 : vector<2x96xf32>
    %325 = math.exp %324 : vector<2x96xf32>
    %cst_58 = arith.constant 1.000000e+00 : f32
    %326 = vector.broadcast %cst_58 : f32 to vector<2x96xf32>
    %327 = arith.addf %326, %325 : vector<2x96xf32>
    %328 = arith.divf %326, %327 : vector<2x96xf32>
    %329 = vector.extract_strided_slice %322 {offsets = [0, 96], sizes = [2, 32], strides = [1, 1]} : vector<2x128xf32> to vector<2x32xf32>
    %330 = math.tanh %329 : vector<2x32xf32>
    %331 = vector.extract_strided_slice %328 {offsets = [0, 0], sizes = [2, 32], strides = [1, 1]} : vector<2x96xf32> to vector<2x32xf32>
    %332 = vector.extract_strided_slice %328 {offsets = [0, 32], sizes = [2, 32], strides = [1, 1]} : vector<2x96xf32> to vector<2x32xf32>
    %333 = vector.extract_strided_slice %328 {offsets = [0, 64], sizes = [2, 32], strides = [1, 1]} : vector<2x96xf32> to vector<2x32xf32>
    %334 = arith.mulf %332, %271 : vector<2x32xf32>
    %335 = arith.mulf %331, %330 : vector<2x32xf32>
    %336 = arith.addf %334, %335 : vector<2x32xf32>
    %337 = math.tanh %336 : vector<2x32xf32>
    %338 = arith.mulf %333, %337 : vector<2x32xf32>
    %c6 = arith.constant 6 : index
    %c0_59 = arith.constant 0 : index
    %c0_60 = arith.constant 0 : index
    %339 = vector.load %arg0[%c6, %c0_59, %c0_60] : memref<8x2x8xf32, #tpu.memory_space<vmem>>, vector<1x2x8xf32>
    %340 = vector.shape_cast %339 : vector<1x2x8xf32> to vector<2x8xf32>
    %341 = tpu.concatenate %296, %340 in 1 : vector<2x32xf32>, vector<2x8xf32> -> vector<2x40xf32>
    %342 = arith.truncf %341 : vector<2x40xf32> to vector<2x40xbf16>
    %cst_61 = arith.constant dense<0.000000e+00> : vector<2x128xf32>
    %343 = tpu.matmul %342, %0, %cst_61 {dimension_numbers = #tpu.dot_dimension_numbers<[1], [0], [0], [1], [0, 0, 1, 1], [], []>} : vector<2x40xbf16>, vector<40x128xbf16>, vector<2x128xf32> -> vector<2x128xf32>
    %344 = vector.broadcast %3 : vector<1x128xf32> to vector<2x128xf32>
    %345 = arith.addf %343, %344 : vector<2x128xf32>
    %346 = vector.extract_strided_slice %345 {offsets = [0, 0], sizes = [2, 96], strides = [1, 1]} : vector<2x128xf32> to vector<2x96xf32>
    %347 = arith.negf %346 : vector<2x96xf32>
    %348 = math.exp %347 : vector<2x96xf32>
    %cst_62 = arith.constant 1.000000e+00 : f32
    %349 = vector.broadcast %cst_62 : f32 to vector<2x96xf32>
    %350 = arith.addf %349, %348 : vector<2x96xf32>
    %351 = arith.divf %349, %350 : vector<2x96xf32>
    %352 = vector.extract_strided_slice %345 {offsets = [0, 96], sizes = [2, 32], strides = [1, 1]} : vector<2x128xf32> to vector<2x32xf32>
    %353 = math.tanh %352 : vector<2x32xf32>
    %354 = vector.extract_strided_slice %351 {offsets = [0, 0], sizes = [2, 32], strides = [1, 1]} : vector<2x96xf32> to vector<2x32xf32>
    %355 = vector.extract_strided_slice %351 {offsets = [0, 32], sizes = [2, 32], strides = [1, 1]} : vector<2x96xf32> to vector<2x32xf32>
    %356 = vector.extract_strided_slice %351 {offsets = [0, 64], sizes = [2, 32], strides = [1, 1]} : vector<2x96xf32> to vector<2x32xf32>
    %357 = arith.mulf %355, %294 : vector<2x32xf32>
    %358 = arith.mulf %354, %353 : vector<2x32xf32>
    %359 = arith.addf %357, %358 : vector<2x32xf32>
    %360 = math.tanh %359 : vector<2x32xf32>
    %361 = arith.mulf %356, %360 : vector<2x32xf32>
    %362 = tpu.concatenate %317, %296 in 1 : vector<2x32xf32>, vector<2x32xf32> -> vector<2x64xf32>
    %363 = arith.truncf %362 : vector<2x64xf32> to vector<2x64xbf16>
    %cst_63 = arith.constant dense<0.000000e+00> : vector<2x128xf32>
    %364 = tpu.matmul %363, %1, %cst_63 {dimension_numbers = #tpu.dot_dimension_numbers<[1], [0], [0], [1], [0, 0, 1, 1], [], []>} : vector<2x64xbf16>, vector<64x128xbf16>, vector<2x128xf32> -> vector<2x128xf32>
    %365 = vector.broadcast %4 : vector<1x128xf32> to vector<2x128xf32>
    %366 = arith.addf %364, %365 : vector<2x128xf32>
    %367 = vector.extract_strided_slice %366 {offsets = [0, 0], sizes = [2, 96], strides = [1, 1]} : vector<2x128xf32> to vector<2x96xf32>
    %368 = arith.negf %367 : vector<2x96xf32>
    %369 = math.exp %368 : vector<2x96xf32>
    %cst_64 = arith.constant 1.000000e+00 : f32
    %370 = vector.broadcast %cst_64 : f32 to vector<2x96xf32>
    %371 = arith.addf %370, %369 : vector<2x96xf32>
    %372 = arith.divf %370, %371 : vector<2x96xf32>
    %373 = vector.extract_strided_slice %366 {offsets = [0, 96], sizes = [2, 32], strides = [1, 1]} : vector<2x128xf32> to vector<2x32xf32>
    %374 = math.tanh %373 : vector<2x32xf32>
    %375 = vector.extract_strided_slice %372 {offsets = [0, 0], sizes = [2, 32], strides = [1, 1]} : vector<2x96xf32> to vector<2x32xf32>
    %376 = vector.extract_strided_slice %372 {offsets = [0, 32], sizes = [2, 32], strides = [1, 1]} : vector<2x96xf32> to vector<2x32xf32>
    %377 = vector.extract_strided_slice %372 {offsets = [0, 64], sizes = [2, 32], strides = [1, 1]} : vector<2x96xf32> to vector<2x32xf32>
    %378 = arith.mulf %376, %315 : vector<2x32xf32>
    %379 = arith.mulf %375, %374 : vector<2x32xf32>
    %380 = arith.addf %378, %379 : vector<2x32xf32>
    %381 = math.tanh %380 : vector<2x32xf32>
    %382 = arith.mulf %377, %381 : vector<2x32xf32>
    %383 = tpu.concatenate %338, %317 in 1 : vector<2x32xf32>, vector<2x32xf32> -> vector<2x64xf32>
    %384 = arith.truncf %383 : vector<2x64xf32> to vector<2x64xbf16>
    %cst_65 = arith.constant dense<0.000000e+00> : vector<2x128xf32>
    %385 = tpu.matmul %384, %2, %cst_65 {dimension_numbers = #tpu.dot_dimension_numbers<[1], [0], [0], [1], [0, 0, 1, 1], [], []>} : vector<2x64xbf16>, vector<64x128xbf16>, vector<2x128xf32> -> vector<2x128xf32>
    %386 = vector.broadcast %5 : vector<1x128xf32> to vector<2x128xf32>
    %387 = arith.addf %385, %386 : vector<2x128xf32>
    %388 = vector.extract_strided_slice %387 {offsets = [0, 0], sizes = [2, 96], strides = [1, 1]} : vector<2x128xf32> to vector<2x96xf32>
    %389 = arith.negf %388 : vector<2x96xf32>
    %390 = math.exp %389 : vector<2x96xf32>
    %cst_66 = arith.constant 1.000000e+00 : f32
    %391 = vector.broadcast %cst_66 : f32 to vector<2x96xf32>
    %392 = arith.addf %391, %390 : vector<2x96xf32>
    %393 = arith.divf %391, %392 : vector<2x96xf32>
    %394 = vector.extract_strided_slice %387 {offsets = [0, 96], sizes = [2, 32], strides = [1, 1]} : vector<2x128xf32> to vector<2x32xf32>
    %395 = math.tanh %394 : vector<2x32xf32>
    %396 = vector.extract_strided_slice %393 {offsets = [0, 0], sizes = [2, 32], strides = [1, 1]} : vector<2x96xf32> to vector<2x32xf32>
    %397 = vector.extract_strided_slice %393 {offsets = [0, 32], sizes = [2, 32], strides = [1, 1]} : vector<2x96xf32> to vector<2x32xf32>
    %398 = vector.extract_strided_slice %393 {offsets = [0, 64], sizes = [2, 32], strides = [1, 1]} : vector<2x96xf32> to vector<2x32xf32>
    %399 = arith.mulf %397, %336 : vector<2x32xf32>
    %400 = arith.mulf %396, %395 : vector<2x32xf32>
    %401 = arith.addf %399, %400 : vector<2x32xf32>
    %402 = math.tanh %401 : vector<2x32xf32>
    %403 = arith.mulf %398, %402 : vector<2x32xf32>
    %c7 = arith.constant 7 : index
    %c0_67 = arith.constant 0 : index
    %c0_68 = arith.constant 0 : index
    %404 = vector.load %arg0[%c7, %c0_67, %c0_68] : memref<8x2x8xf32, #tpu.memory_space<vmem>>, vector<1x2x8xf32>
    %405 = vector.shape_cast %404 : vector<1x2x8xf32> to vector<2x8xf32>
    %406 = tpu.concatenate %361, %405 in 1 : vector<2x32xf32>, vector<2x8xf32> -> vector<2x40xf32>
    %407 = arith.truncf %406 : vector<2x40xf32> to vector<2x40xbf16>
    %cst_69 = arith.constant dense<0.000000e+00> : vector<2x128xf32>
    %408 = tpu.matmul %407, %0, %cst_69 {dimension_numbers = #tpu.dot_dimension_numbers<[1], [0], [0], [1], [0, 0, 1, 1], [], []>} : vector<2x40xbf16>, vector<40x128xbf16>, vector<2x128xf32> -> vector<2x128xf32>
    %409 = vector.broadcast %3 : vector<1x128xf32> to vector<2x128xf32>
    %410 = arith.addf %408, %409 : vector<2x128xf32>
    %411 = vector.extract_strided_slice %410 {offsets = [0, 0], sizes = [2, 96], strides = [1, 1]} : vector<2x128xf32> to vector<2x96xf32>
    %412 = arith.negf %411 : vector<2x96xf32>
    %413 = math.exp %412 : vector<2x96xf32>
    %cst_70 = arith.constant 1.000000e+00 : f32
    %414 = vector.broadcast %cst_70 : f32 to vector<2x96xf32>
    %415 = arith.addf %414, %413 : vector<2x96xf32>
    %416 = arith.divf %414, %415 : vector<2x96xf32>
    %417 = vector.extract_strided_slice %410 {offsets = [0, 96], sizes = [2, 32], strides = [1, 1]} : vector<2x128xf32> to vector<2x32xf32>
    %418 = math.tanh %417 : vector<2x32xf32>
    %419 = vector.extract_strided_slice %416 {offsets = [0, 0], sizes = [2, 32], strides = [1, 1]} : vector<2x96xf32> to vector<2x32xf32>
    %420 = vector.extract_strided_slice %416 {offsets = [0, 32], sizes = [2, 32], strides = [1, 1]} : vector<2x96xf32> to vector<2x32xf32>
    %421 = vector.extract_strided_slice %416 {offsets = [0, 64], sizes = [2, 32], strides = [1, 1]} : vector<2x96xf32> to vector<2x32xf32>
    %422 = arith.mulf %420, %359 : vector<2x32xf32>
    %423 = arith.mulf %419, %418 : vector<2x32xf32>
    %424 = arith.addf %422, %423 : vector<2x32xf32>
    %425 = math.tanh %424 : vector<2x32xf32>
    %426 = arith.mulf %421, %425 : vector<2x32xf32>
    %427 = tpu.concatenate %382, %361 in 1 : vector<2x32xf32>, vector<2x32xf32> -> vector<2x64xf32>
    %428 = arith.truncf %427 : vector<2x64xf32> to vector<2x64xbf16>
    %cst_71 = arith.constant dense<0.000000e+00> : vector<2x128xf32>
    %429 = tpu.matmul %428, %1, %cst_71 {dimension_numbers = #tpu.dot_dimension_numbers<[1], [0], [0], [1], [0, 0, 1, 1], [], []>} : vector<2x64xbf16>, vector<64x128xbf16>, vector<2x128xf32> -> vector<2x128xf32>
    %430 = vector.broadcast %4 : vector<1x128xf32> to vector<2x128xf32>
    %431 = arith.addf %429, %430 : vector<2x128xf32>
    %432 = vector.extract_strided_slice %431 {offsets = [0, 0], sizes = [2, 96], strides = [1, 1]} : vector<2x128xf32> to vector<2x96xf32>
    %433 = arith.negf %432 : vector<2x96xf32>
    %434 = math.exp %433 : vector<2x96xf32>
    %cst_72 = arith.constant 1.000000e+00 : f32
    %435 = vector.broadcast %cst_72 : f32 to vector<2x96xf32>
    %436 = arith.addf %435, %434 : vector<2x96xf32>
    %437 = arith.divf %435, %436 : vector<2x96xf32>
    %438 = vector.extract_strided_slice %431 {offsets = [0, 96], sizes = [2, 32], strides = [1, 1]} : vector<2x128xf32> to vector<2x32xf32>
    %439 = math.tanh %438 : vector<2x32xf32>
    %440 = vector.extract_strided_slice %437 {offsets = [0, 0], sizes = [2, 32], strides = [1, 1]} : vector<2x96xf32> to vector<2x32xf32>
    %441 = vector.extract_strided_slice %437 {offsets = [0, 32], sizes = [2, 32], strides = [1, 1]} : vector<2x96xf32> to vector<2x32xf32>
    %442 = vector.extract_strided_slice %437 {offsets = [0, 64], sizes = [2, 32], strides = [1, 1]} : vector<2x96xf32> to vector<2x32xf32>
    %443 = arith.mulf %441, %380 : vector<2x32xf32>
    %444 = arith.mulf %440, %439 : vector<2x32xf32>
    %445 = arith.addf %443, %444 : vector<2x32xf32>
    %446 = math.tanh %445 : vector<2x32xf32>
    %447 = arith.mulf %442, %446 : vector<2x32xf32>
    %448 = tpu.concatenate %403, %382 in 1 : vector<2x32xf32>, vector<2x32xf32> -> vector<2x64xf32>
    %449 = arith.truncf %448 : vector<2x64xf32> to vector<2x64xbf16>
    %cst_73 = arith.constant dense<0.000000e+00> : vector<2x128xf32>
    %450 = tpu.matmul %449, %2, %cst_73 {dimension_numbers = #tpu.dot_dimension_numbers<[1], [0], [0], [1], [0, 0, 1, 1], [], []>} : vector<2x64xbf16>, vector<64x128xbf16>, vector<2x128xf32> -> vector<2x128xf32>
    %451 = vector.broadcast %5 : vector<1x128xf32> to vector<2x128xf32>
    %452 = arith.addf %450, %451 : vector<2x128xf32>
    %453 = vector.extract_strided_slice %452 {offsets = [0, 0], sizes = [2, 96], strides = [1, 1]} : vector<2x128xf32> to vector<2x96xf32>
    %454 = arith.negf %453 : vector<2x96xf32>
    %455 = math.exp %454 : vector<2x96xf32>
    %cst_74 = arith.constant 1.000000e+00 : f32
    %456 = vector.broadcast %cst_74 : f32 to vector<2x96xf32>
    %457 = arith.addf %456, %455 : vector<2x96xf32>
    %458 = arith.divf %456, %457 : vector<2x96xf32>
    %459 = vector.extract_strided_slice %452 {offsets = [0, 96], sizes = [2, 32], strides = [1, 1]} : vector<2x128xf32> to vector<2x32xf32>
    %460 = math.tanh %459 : vector<2x32xf32>
    %461 = vector.extract_strided_slice %458 {offsets = [0, 0], sizes = [2, 32], strides = [1, 1]} : vector<2x96xf32> to vector<2x32xf32>
    %462 = vector.extract_strided_slice %458 {offsets = [0, 32], sizes = [2, 32], strides = [1, 1]} : vector<2x96xf32> to vector<2x32xf32>
    %463 = vector.extract_strided_slice %458 {offsets = [0, 64], sizes = [2, 32], strides = [1, 1]} : vector<2x96xf32> to vector<2x32xf32>
    %464 = arith.mulf %462, %401 : vector<2x32xf32>
    %465 = arith.mulf %461, %460 : vector<2x32xf32>
    %466 = arith.addf %464, %465 : vector<2x32xf32>
    %467 = math.tanh %466 : vector<2x32xf32>
    %468 = arith.mulf %463, %467 : vector<2x32xf32>
    %469 = tpu.concatenate %447, %426 in 1 : vector<2x32xf32>, vector<2x32xf32> -> vector<2x64xf32>
    %470 = arith.truncf %469 : vector<2x64xf32> to vector<2x64xbf16>
    %cst_75 = arith.constant dense<0.000000e+00> : vector<2x128xf32>
    %471 = tpu.matmul %470, %1, %cst_75 {dimension_numbers = #tpu.dot_dimension_numbers<[1], [0], [0], [1], [0, 0, 1, 1], [], []>} : vector<2x64xbf16>, vector<64x128xbf16>, vector<2x128xf32> -> vector<2x128xf32>
    %472 = vector.broadcast %4 : vector<1x128xf32> to vector<2x128xf32>
    %473 = arith.addf %471, %472 : vector<2x128xf32>
    %474 = vector.extract_strided_slice %473 {offsets = [0, 0], sizes = [2, 96], strides = [1, 1]} : vector<2x128xf32> to vector<2x96xf32>
    %475 = arith.negf %474 : vector<2x96xf32>
    %476 = math.exp %475 : vector<2x96xf32>
    %cst_76 = arith.constant 1.000000e+00 : f32
    %477 = vector.broadcast %cst_76 : f32 to vector<2x96xf32>
    %478 = arith.addf %477, %476 : vector<2x96xf32>
    %479 = arith.divf %477, %478 : vector<2x96xf32>
    %480 = vector.extract_strided_slice %473 {offsets = [0, 96], sizes = [2, 32], strides = [1, 1]} : vector<2x128xf32> to vector<2x32xf32>
    %481 = math.tanh %480 : vector<2x32xf32>
    %482 = vector.extract_strided_slice %479 {offsets = [0, 0], sizes = [2, 32], strides = [1, 1]} : vector<2x96xf32> to vector<2x32xf32>
    %483 = vector.extract_strided_slice %479 {offsets = [0, 32], sizes = [2, 32], strides = [1, 1]} : vector<2x96xf32> to vector<2x32xf32>
    %484 = vector.extract_strided_slice %479 {offsets = [0, 64], sizes = [2, 32], strides = [1, 1]} : vector<2x96xf32> to vector<2x32xf32>
    %485 = arith.mulf %483, %445 : vector<2x32xf32>
    %486 = arith.mulf %482, %481 : vector<2x32xf32>
    %487 = arith.addf %485, %486 : vector<2x32xf32>
    %488 = math.tanh %487 : vector<2x32xf32>
    %489 = arith.mulf %484, %488 : vector<2x32xf32>
    %490 = tpu.concatenate %468, %447 in 1 : vector<2x32xf32>, vector<2x32xf32> -> vector<2x64xf32>
    %491 = arith.truncf %490 : vector<2x64xf32> to vector<2x64xbf16>
    %cst_77 = arith.constant dense<0.000000e+00> : vector<2x128xf32>
    %492 = tpu.matmul %491, %2, %cst_77 {dimension_numbers = #tpu.dot_dimension_numbers<[1], [0], [0], [1], [0, 0, 1, 1], [], []>} : vector<2x64xbf16>, vector<64x128xbf16>, vector<2x128xf32> -> vector<2x128xf32>
    %493 = vector.broadcast %5 : vector<1x128xf32> to vector<2x128xf32>
    %494 = arith.addf %492, %493 : vector<2x128xf32>
    %495 = vector.extract_strided_slice %494 {offsets = [0, 0], sizes = [2, 96], strides = [1, 1]} : vector<2x128xf32> to vector<2x96xf32>
    %496 = arith.negf %495 : vector<2x96xf32>
    %497 = math.exp %496 : vector<2x96xf32>
    %cst_78 = arith.constant 1.000000e+00 : f32
    %498 = vector.broadcast %cst_78 : f32 to vector<2x96xf32>
    %499 = arith.addf %498, %497 : vector<2x96xf32>
    %500 = arith.divf %498, %499 : vector<2x96xf32>
    %501 = vector.extract_strided_slice %494 {offsets = [0, 96], sizes = [2, 32], strides = [1, 1]} : vector<2x128xf32> to vector<2x32xf32>
    %502 = math.tanh %501 : vector<2x32xf32>
    %503 = vector.extract_strided_slice %500 {offsets = [0, 0], sizes = [2, 32], strides = [1, 1]} : vector<2x96xf32> to vector<2x32xf32>
    %504 = vector.extract_strided_slice %500 {offsets = [0, 32], sizes = [2, 32], strides = [1, 1]} : vector<2x96xf32> to vector<2x32xf32>
    %505 = vector.extract_strided_slice %500 {offsets = [0, 64], sizes = [2, 32], strides = [1, 1]} : vector<2x96xf32> to vector<2x32xf32>
    %506 = arith.mulf %504, %466 : vector<2x32xf32>
    %507 = arith.mulf %503, %502 : vector<2x32xf32>
    %508 = arith.addf %506, %507 : vector<2x32xf32>
    %509 = math.tanh %508 : vector<2x32xf32>
    %510 = arith.mulf %505, %509 : vector<2x32xf32>
    %511 = tpu.concatenate %510, %489 in 1 : vector<2x32xf32>, vector<2x32xf32> -> vector<2x64xf32>
    %512 = arith.truncf %511 : vector<2x64xf32> to vector<2x64xbf16>
    %cst_79 = arith.constant dense<0.000000e+00> : vector<2x128xf32>
    %513 = tpu.matmul %512, %2, %cst_79 {dimension_numbers = #tpu.dot_dimension_numbers<[1], [0], [0], [1], [0, 0, 1, 1], [], []>} : vector<2x64xbf16>, vector<64x128xbf16>, vector<2x128xf32> -> vector<2x128xf32>
    %514 = vector.broadcast %5 : vector<1x128xf32> to vector<2x128xf32>
    %515 = arith.addf %513, %514 : vector<2x128xf32>
    %516 = vector.extract_strided_slice %515 {offsets = [0, 0], sizes = [2, 96], strides = [1, 1]} : vector<2x128xf32> to vector<2x96xf32>
    %517 = arith.negf %516 : vector<2x96xf32>
    %518 = math.exp %517 : vector<2x96xf32>
    %cst_80 = arith.constant 1.000000e+00 : f32
    %519 = vector.broadcast %cst_80 : f32 to vector<2x96xf32>
    %520 = arith.addf %519, %518 : vector<2x96xf32>
    %521 = arith.divf %519, %520 : vector<2x96xf32>
    %522 = vector.extract_strided_slice %515 {offsets = [0, 96], sizes = [2, 32], strides = [1, 1]} : vector<2x128xf32> to vector<2x32xf32>
    %523 = math.tanh %522 : vector<2x32xf32>
    %524 = vector.extract_strided_slice %521 {offsets = [0, 0], sizes = [2, 32], strides = [1, 1]} : vector<2x96xf32> to vector<2x32xf32>
    %525 = vector.extract_strided_slice %521 {offsets = [0, 32], sizes = [2, 32], strides = [1, 1]} : vector<2x96xf32> to vector<2x32xf32>
    %526 = vector.extract_strided_slice %521 {offsets = [0, 64], sizes = [2, 32], strides = [1, 1]} : vector<2x96xf32> to vector<2x32xf32>
    %527 = arith.mulf %525, %508 : vector<2x32xf32>
    %528 = arith.mulf %524, %523 : vector<2x32xf32>
    %529 = arith.addf %527, %528 : vector<2x32xf32>
    %530 = math.tanh %529 : vector<2x32xf32>
    %531 = arith.mulf %526, %530 : vector<2x32xf32>
    %532 = arith.truncf %531 : vector<2x32xf32> to vector<2x32xbf16>
    %c0_81 = arith.constant 0 : index
    %c0_82 = arith.constant 0 : index
    %533 = vector.load %arg7[%c0_81, %c0_82] : memref<32x4xbf16, #tpu.memory_space<vmem>>, vector<32x4xbf16>
    %cst_83 = arith.constant dense<0.000000e+00> : vector<2x4xf32>
    %534 = tpu.matmul %532, %533, %cst_83 {dimension_numbers = #tpu.dot_dimension_numbers<[1], [0], [0], [1], [0, 0, 1, 1], [], []>} : vector<2x32xbf16>, vector<32x4xbf16>, vector<2x4xf32> -> vector<2x4xf32>
    %c0_84 = arith.constant 0 : index
    %c0_85 = arith.constant 0 : index
    %535 = vector.load %arg8[%c0_84, %c0_85] : memref<1x4xf32, #tpu.memory_space<vmem>>, vector<1x4xf32>
    %536 = vector.broadcast %535 : vector<1x4xf32> to vector<2x4xf32>
    %537 = arith.addf %534, %536 : vector<2x4xf32>
    %c0_86 = arith.constant 0 : index
    %c0_87 = arith.constant 0 : index
    %538 = vector.load %arg9[%c0_86, %c0_87] : memref<2x4xf32, #tpu.memory_space<vmem>>, vector<2x4xf32>
    tpu.vector_store %arg9[%c0_86, %c0_87], %537 {strides = array<i32>} : memref<2x4xf32, #tpu.memory_space<vmem>>, vector<2x4xf32>,
    return
  }
}

</mosaic_0001>

<bundles_post_ra>
// kernel: attention_model_forward.1
= control target key start
LH: loop header
LB: loop body
LE: loop exit
PB: predicated region body
PF: predicated region fallthrough
CT: control target
= control target key end

     0   :  { %14 = vsyncpa [#allocation3], 0  ;;  %s3723_s0 = inlined_call_operand.vmem [shape: f32[8,2,8], index: 0, kind: input, shape index: {}]   ;;  %s3724_s1 = inlined_call_operand.hbm [shape: bf16[40,128], index: 1, kind: input, shape index: {}]   ;;  %s3725_s2 = inlined_call_operand.hbm [shape: f32[1,128], index: 2, kind: input, shape index: {}]   ;;  %s3726_s3 = inlined_call_operand.vmem [shape: bf16[64,128], index: 3, kind: input, shape index: {}]   ;;  %s3727_s4 = inlined_call_operand.hbm [shape: f32[1,128], index: 4, kind: input, shape index: {}]   ;;  %s3728_s5 = inlined_call_operand.vmem [shape: bf16[64,128], index: 5, kind: input, shape index: {}]   ;;  %s3729_s6 = inlined_call_operand.hbm [shape: f32[1,128], index: 6, kind: input, shape index: {}]   ;;  %s3730_s7 = inlined_call_operand.vmem [shape: bf16[32,4], index: 7, kind: input, shape index: {}]   ;;  %s3731_s8 = inlined_call_operand.hbm [shape: f32[1,4], index: 8, kind: input, shape index: {}]   ;;  %s3732_s9 = inlined_call_operand.hbm [shape: f32[2,4], index: 9, kind: output, shape index: {}]  }
   0x1   :  { %15 = vsyncpa [#allocation6], 0 }
   0x2   :  { %16 = vsyncpa [#allocation9], 0 }
   0x3   :  { %17 = vsyncpa [#allocation4], 0  ;;  %s3023_s30 = smov [#allocation5]   ;;  %s3024_s11 = smov [#allocation8]  }
   0x4   :  { %s38_s10 = sshll.u32 %s3023_s30, 4  ;;  %s62_s12 = sshll.u32 %s3024_s11, 4  ;;  %s39_s10 = int_to_ptr.vmem [resolvable:$true] %s38_s10  ;;  %s63_s12 = int_to_ptr.vmem [resolvable:$true] %s62_s12 }
   0x5   :  { %s2903_s13 = scalar_lea.vmem %s39_s10, 16  ;;  %s2907_s14 = scalar_lea.vmem %s39_s10, 32 }
   0x6   :  { %p2904_p0 = scmp.ne.s32.totalorder %s39_s10, %s2903_s13  ;;  %p2908_p1 = scmp.lt.s32.totalorder %s39_s10, %s39_s10 }
   0x7   :  { %p2909_p2 = scmp.lt.s32.totalorder %s2907_s14, %s2903_s13 }
   0x9   :  { %p2910_p3 = por %p2909_p2, %p2908_p1 }
   0xb   :  { %p2911_p4 = pnand %p2910_p3, %p2904_p0 }
   0xd   :  { %2914 = shalt.err (!%p2911_p4)
}
   0xe   :  { %41 = dma.hbm_to_vmem [thread:$0]  %s3725_s2, 16, %s39_s10, [#allocation6]  }
   0xf   :  { %s2923_s17 = scalar_lea.vmem %s63_s12, 16  ;;  %s2927_s18 = scalar_lea.vmem %s63_s12, 32 }
  0x10   :  { %p2924_p5 = scmp.ne.s32.totalorder %s63_s12, %s2923_s17  ;;  %p2928_p6 = scmp.lt.s32.totalorder %s63_s12, %s63_s12 }
  0x11   :  { %p2929_p7 = scmp.lt.s32.totalorder %s2927_s18, %s2923_s17 }
  0x13   :  { %p2930_p8 = por %p2929_p7, %p2928_p6 }
  0x15   :  { %p2931_p9 = pnand %p2930_p8, %p2924_p5 }
  0x17   :  { %2934 = shalt.err (!%p2931_p9)
}
  0x18   :  { %65 = dma.hbm_to_vmem [thread:$0]  %s3729_s6, 16, %s63_s12, [#allocation9]  }
  0x19   :  { %s3025_s21 = smov [#allocation2]  }
  0x1a   :  { %s25_s22 = sshll.u32 %s3025_s21, 4  ;;  %s26_s22 = int_to_ptr.vmem [resolvable:$true] %s25_s22 }
  0x1b   :  { %s2943_s23 = scalar_lea.vmem %s26_s22, 320  ;;  %p2948_p11 = scmp.lt.s32.totalorder %s26_s22, %s26_s22 }
  0x1c   :  { %p2944_p10 = scmp.ne.s32.totalorder %s26_s22, %s2943_s23  ;;  %p2949_p12 = scmp.lt.s32.totalorder %s2943_s23, %s2943_s23 }
  0x1e   :  { %p2950_p13 = por %p2949_p12, %p2948_p11 }
  0x20   :  { %p2951_p0 = pnand %p2950_p13, %p2944_p10 }
  0x22   :  { %2954 = shalt.err (!%p2951_p0)
}
  0x23   :  { %s3026_s2 = smov 64   ;;  %s3027_s24 = smov 4  }
  0x24   :  { %31 = dma.hbm_to_vmem [thread:$0]  %s3724_s1, 320, %s26_s22, [#allocation3], %s3026_s2, %s3026_s2, %s3027_s24  }
  0x25   :  { %s3028_s27 = smov [#allocation7]   ;;  %s3029_s28 = smov [#allocation10]  }
  0x26   :  { %s50_s6 = sshll.u32 %s3028_s27, 4  ;;  %s74_s29 = sshll.u32 %s3029_s28, 4  ;;  %s51_s6 = int_to_ptr.vmem [resolvable:$true] %s50_s6  ;;  %s75_s29 = int_to_ptr.vmem [resolvable:$true] %s74_s29 }
  0x27   :  { %s2963_s30 = scalar_lea.vmem %s51_s6, 16  ;;  %s2967_s10 = scalar_lea.vmem %s51_s6, 32 }
  0x28   :  { %p2964_p1 = scmp.ne.s32.totalorder %s51_s6, %s2963_s30  ;;  %p2968_p2 = scmp.lt.s32.totalorder %s51_s6, %s51_s6 }
  0x29   :  { %p2969_p3 = scmp.lt.s32.totalorder %s2967_s10, %s2963_s30 }
  0x2b   :  { %p2970_p4 = por %p2969_p3, %p2968_p2 }
  0x2d   :  { %p2971_p5 = pnand %p2970_p4, %p2964_p1 }
  0x2f   :  { %2974 = shalt.err (!%p2971_p5)
}
  0x30   :  { %53 = dma.hbm_to_vmem [thread:$0]  %s3727_s4, 16, %s51_s6, [#allocation6]  }
  0x31   :  { %s2983_s13 = scalar_lea.vmem %s75_s29, 16  ;;  %s2987_s1 = scalar_lea.vmem %s75_s29, 32 }
  0x32   :  { %p2984_p6 = scmp.ne.s32.totalorder %s75_s29, %s2983_s13  ;;  %p2988_p7 = scmp.lt.s32.totalorder %s75_s29, %s75_s29 }
  0x33   :  { %p2989_p8 = scmp.lt.s32.totalorder %s2987_s1, %s2983_s13 }
  0x35   :  { %p2990_p9 = por %p2989_p8, %p2988_p7 }
  0x37   :  { %p2991_p10 = pnand %p2990_p9, %p2984_p6 }
  0x39   :  { %2994 = shalt.err (!%p2991_p10)
}
  0x3a   :  { %77 = dma.hbm_to_vmem [thread:$0]  %s3731_s8, 16, %s75_s29, [#allocation9]  }
  0x3b   :  { %3015 = dma.done.wait [#allocation3], 320  }
  0x3c   :  { %3016 = vsyncadd [#allocation3], 4294966976 }
  0x3d   :  { %3017 = dma.done.wait [#allocation6], 32  }
  0x3e   :  { %3018 = vsyncadd [#allocation6], 4294967264 }
  0x3f   :  { %3019 = dma.done.wait [#allocation9], 32  }
  0x40   :  { %3020 = vsyncadd [#allocation9], 4294967264  ;;  %v3030_v0 = vmov 0.0   ;;  %vm3031_vm0 = vmmov 0   ;;  %vm151_vm1 = vcmask 1043456   ;;  %s3032_s16 = smov 32  }
  0x41   :  { %2320 = vmatprep.subr.bf16.mxu0 %v3030_v0  ;;  %2330 = vmatprep.subr.bf16.mxu1 %v3030_v0  ;;  %v118_v1 = vld [vmem:[%s3723_s0] sm:$0x3]  ;;  %v2677_v2 = vld [vmem:[#allocation2 + $0x10] ss:$0 sps:$4 sm:$0xff]   ;;  %v3115_v4 = vld [vmem:[#allocation2 + $0x8] sm:$0xff]   ;;  %vm123_vm2 = vcmask 261120  }
  0x42   :  { %2326 = vmatprep.mubr.msk.bf16.mxu0 %vm3031_vm0, %v3030_v0  ;;  %2336 = vmatprep.mubr.msk.bf16.mxu1 %vm3031_vm0, %v3030_v0  ;;  %v3112_v3 = vsel %vm151_vm1, %v2677_v2, 0  ;;  %v3120_v5 = vld [vmem:[#allocation2] sm:$0xff]   ;;  %vm147_vm3 = vcmask 326656   ;;  %v3134_v9 = vld [vmem:[#allocation5] ss:$0 sm:$0xff]  ;;  %v3145_v25 = vld [vmem:[%s3726_s3 + $0x18] sm:$0xff]  }
  0x43   :  { %120 = vrot.lane.b32.xlu0 %v118_v1, %s3032_s16  ;;  %2321 = vmatpush3.bf16.msra.mxu0 %v3112_v3  ;;  %v3151_v26 = vld [vmem:[%s3726_s3 + $0x10] sm:$0xff]   ;;  %v2138_v28 = vld [vmem:[%s3723_s0 + $0x2] sm:$0x3]  ;;  %v3164_v29 = vld [vmem:[%s3726_s3 + $0x8] sm:$0xff]   ;;  %s3033_s27 = smov 96   ;;  %vm333_vm4 = vcmask 523264  }
  0x44   :  { %2331 = vmatpush3.bf16.msra.mxu1 %v3112_v3  ;;  %2322 = vmatprep.subr.bf16.mxu0 %v3030_v0  ;;  %v3171_v30 = vld [vmem:[%s3726_s3] sm:$0xff]   ;;  %v3192_v43 = vld [vmem:[#allocation7] ss:$0 sm:$0xff]  ;;  %s3034_s17 = smov [#allocation11]   ;;  %vm2113_vm5 = vcmask 25600  }
  0x45   :  { %2332 = vmatprep.subr.bf16.mxu1 %v3030_v0  ;;  %s2121_s18 = sshll.u32 %s3034_s17, 4  ;;  %s2122_s18 = int_to_ptr.vmem [resolvable:$true] %s2121_s18 }
  0x46   :  { %p3000_p12 = scmp.lt.s32.totalorder %s2122_s18, %s2122_s18 }
  0x47   :  { %2323 = vmatpush3.bf16.msra.mxu0 %v3115_v4 }
  0x48   :  { %2333 = vmatpush3.bf16.msra.mxu1 %v3115_v4  ;;  %2324 = vmatprep.subr.bf16.mxu0 %v3030_v0 }
  0x49   :  { %2334 = vmatprep.subr.bf16.mxu1 %v3030_v0 }
  0x4b   :  { %2325 = vmatpush3.bf16.msra.mxu0 %v3120_v5 }
  0x4c   :  { %2335 = vmatpush3.bf16.msra.mxu1 %v3120_v5  ;;  %2340 = vmatprep.subr.bf16.mxu0 %v3030_v0 }
  0x4d   :  { %2352 = vmatprep.subr.bf16.mxu1 %v3030_v0 }
  0xb5   :  { %v121_v6 = vpop.permute.xlu0 %120 }
  0xb6   :  { %v124_v7 = vsel %vm123_vm2, 0.0, %v121_v6 }
  0xb7   :  { %v125_v8 = vpack.c.bf16 %v124_v7, %v124_v7 }
  0xb9   :  { %2327 = vmatmul.mubr.msk.bf16.vlgmr.msra.gmra.mxu0 %vm147_vm3, %v125_v8 }
  0xba   :  { %2348 = vmatprep.mubr.msk.bf16.mxu0 %vm3031_vm0, %v3030_v0  ;;  %2341 = vmatpush3.bf16.msra.mxu0 %v3145_v25 }
  0xbb   :  { %2342 = vmatprep.subr.bf16.mxu0 %v3030_v0 }
  0xbe   :  { %2343 = vmatpush3.bf16.msra.mxu0 %v3151_v26 }
  0xbf   :  { %2344 = vmatprep.subr.bf16.mxu0 %v3030_v0 }
  0xc2   :  { %2345 = vmatpush3.bf16.msra.mxu0 %v3164_v29 }
  0xc3   :  { %2346 = vmatprep.subr.bf16.mxu0 %v3030_v0 }
  0xc6   :  { %2347 = vmatpush3.bf16.msra.mxu0 %v3171_v30 }
  0xc7   :  { %2374 = vmatprep.subr.bf16.mxu0 %v3030_v0 }
 0x179   :  { %v189_v10 = vpop.f32.mrf.mxu0 }
 0x17a   :  { %v190_v11 = vadd.f32 %v3134_v9, %v189_v10 }
 0x17b   :  { %v2328_v12 = vpop.f32.mrf.mxu0 }
 0x17c   :  { %2690 = vtanh.f32 %v190_v11  ;;  %v2137_v16 = vmul.f32 -1.442695, %v190_v11  ;;  %v3209_v12 = vld [vmem:[%s3728_s5 + $0x18] sm:$0xff]  }
 0x17d   :  { %v192_v13 = vpop.f32.mrf.mxu0 }
 0x17e   :  { %2692 = vpow2.f32 %v2137_v16  ;;  %v3222_v16 = vld [vmem:[%s3728_s5 + $0x10] sm:$0xff]  }
 0x17f   :  { %v2329_v14 = vpop.f32.mrf.mxu0 }
 0x189   :  { %v2691_v15 = vpop.eup %2690 }
 0x18a   :  { %204 = vrot.lane.b32.xlu0 %v2691_v15, %s3032_s16  ;;  %v2148_v15 = vld [vmem:[%s3723_s0 + $0x4] sm:$0x3] }
 0x18b   :  { %v2693_v17 = vpop.eup %2692 }
 0x18c   :  { %v198_v18 = vadd.f32 1.0, %v2693_v17  ;;  %v3229_v17 = vld [vmem:[%s3728_s5 + $0x8] sm:$0xff]  }
 0x18e   :  { %2694 = vrcp.f32 %v198_v18  ;;  %v3236_v18 = vld [vmem:[%s3728_s5] sm:$0xff]  }
 0x19b   :  { %v2695_v19 = vpop.eup %2694 }
 0x19c   :  { %v202_v22 = vmul.f32 0.0, %v2695_v19 }
 0x1fc   :  { %v205_v20 = vpop.permute.xlu0 %204 }
 0x1fd   :  { %v207_v21 = vmul.f32 %v2695_v19, %v205_v20 }
 0x1ff   :  { %209 = vrot.lane.b32.xlu1 %v207_v21, %s3032_s16 }
 0x271   :  { %v210_v23 = vpop.permute.xlu1 %209 }
 0x272   :  { %v3139_v24 = vadd.f32 %v210_v23, %v202_v22 }
 0x274   :  { %2696 = vtanh.f32 %v3139_v24 }
 0x281   :  { %v2697_v27 = vpop.eup %2696 }
 0x282   :  { %215 = vrot.lane.b32.xlu1 %v2697_v27, %s3032_s16 }
 0x286   :  { %226 = vrot.lane.b32.xlu1 %v2138_v28, %s3032_s16 }
 0x2f4   :  { %v216_v31 = vpop.permute.xlu1 %215 }
 0x2f5   :  { %v218_v32 = vmul.f32 %v2695_v19, %v216_v31 }
 0x2f7   :  { %222 = vrot.lane.b32.xlu0 %v218_v32, %s3026_s2 }
 0x2f8   :  { %v227_v33 = vpop.permute.xlu1 %226 }
 0x2fb   :  { %298 = vrot.lane.b32.xlu0 %v218_v32, %s3033_s27 }
 0x369   :  { %v223_v34 = vpop.permute.xlu0 %222 }
 0x36a   :  { %v229_v35 = vsel %vm123_vm2, %v223_v34, %v227_v33 }
 0x36b   :  { %v230_v36 = vpack.c.bf16 %v229_v35, %v229_v35 }
 0x36d   :  { %v299_v37 = vpop.permute.xlu0 %298  ;;  %2337 = vmatmul.mubr.msk.bf16.vlgmr.msra.gmra.mxu1 %vm147_vm3, %v230_v36 }
 0x36e   :  { %v301_v38 = vsel %vm123_vm2, 0.0, %v299_v37  ;;  %2353 = vmatpush3.bf16.msra.mxu1 %v3112_v3  ;;  %2358 = vmatprep.mubr.msk.bf16.mxu1 %vm3031_vm0, %v3030_v0 }
 0x36f   :  { %v302_v39 = vpack.c.bf16 %v301_v38, %v301_v38  ;;  %2354 = vmatprep.subr.bf16.mxu1 %v3030_v0 }
 0x371   :  { %2349 = vmatmul.mubr.msk.bf16.vlgmr.msra.gmra.mxu0 %vm333_vm4, %v302_v39 }
 0x372   :  { %2355 = vmatpush3.bf16.msra.mxu1 %v3115_v4  ;;  %2382 = vmatprep.mubr.msk.bf16.mxu0 %vm3031_vm0, %v3030_v0 }
 0x373   :  { %2356 = vmatprep.subr.bf16.mxu1 %v3030_v0  ;;  %2375 = vmatpush3.bf16.msra.mxu0 %v3209_v12 }
 0x374   :  { %2376 = vmatprep.subr.bf16.mxu0 %v3030_v0 }
 0x376   :  { %2357 = vmatpush3.bf16.msra.mxu1 %v3120_v5 }
 0x377   :  { %2362 = vmatprep.subr.bf16.mxu1 %v3030_v0  ;;  %2377 = vmatpush3.bf16.msra.mxu0 %v3222_v16 }
 0x378   :  { %2378 = vmatprep.subr.bf16.mxu0 %v3030_v0 }
 0x37b   :  { %2379 = vmatpush3.bf16.msra.mxu0 %v3229_v17 }
 0x37c   :  { %2380 = vmatprep.subr.bf16.mxu0 %v3030_v0 }
 0x37f   :  { %2381 = vmatpush3.bf16.msra.mxu0 %v3236_v18 }
 0x380   :  { %2396 = vmatprep.subr.bf16.mxu0 %v3030_v0 }
 0x42d   :  { %v268_v40 = vpop.f32.mrf.mxu1 }
 0x42e   :  { %v269_v41 = vadd.f32 %v3134_v9, %v268_v40 }
 0x42f   :  { %v2338_v42 = vpop.f32.mrf.mxu1 }
 0x430   :  { %2698 = vtanh.f32 %v269_v41  ;;  %v2140_v53 = vmul.f32 -1.442695, %v269_v41 }
 0x431   :  { %v271_v44 = vpop.f32.mrf.mxu1  ;;  %v371_v45 = vpop.f32.mrf.mxu0 }
 0x432   :  { %v372_v46 = vadd.f32 %v3192_v43, %v371_v45 }
 0x433   :  { %v2339_v47 = vpop.f32.mrf.mxu1  ;;  %v2350_v48 = vpop.f32.mrf.mxu0 }
 0x434   :  { %2700 = vtanh.f32 %v372_v46  ;;  %v2147_v54 = vmul.f32 -1.442695, %v372_v46  ;;  %v3278_v46 = vld [vmem:[#allocation8] ss:$0 sm:$0xff] }
 0x435   :  { %v374_v49 = vpop.f32.mrf.mxu0  ;;  %2702 = vpow2.f32 %v2140_v53 }
 0x436   :  { %2704 = vpow2.f32 %v2147_v54 }
 0x437   :  { %v2351_v50 = vpop.f32.mrf.mxu0 }
 0x43d   :  { %v2699_v51 = vpop.eup %2698 }
 0x43e   :  { %283 = vrot.lane.b32.xlu1 %v2699_v51, %s3032_s16 }
 0x441   :  { %v2701_v52 = vpop.eup %2700 }
 0x442   :  { %386 = vrot.lane.b32.xlu0 %v2701_v52, %s3032_s16  ;;  %v2703_v55 = vpop.eup %2702 }
 0x443   :  { %v277_v56 = vadd.f32 1.0, %v2703_v55  ;;  %v2705_v57 = vpop.eup %2704 }
 0x444   :  { %v380_v58 = vadd.f32 1.0, %v2705_v57 }
 0x445   :  { %2706 = vrcp.f32 %v277_v56 }
 0x446   :  { %2708 = vrcp.f32 %v380_v58 }
 0x452   :  { %v2707_v59 = vpop.eup %2706 }
 0x453   :  { %v2709_v62 = vpop.eup %2708  ;;  %v281_v2 = vmul.f32 %v2707_v59, %v3139_v24 }
 0x454   :  { %v384_v8 = vmul.f32 0.0, %v2709_v62 }
 0x4b0   :  { %v284_v60 = vpop.permute.xlu1 %283 }
 0x4b1   :  { %v286_v61 = vmul.f32 %v2707_v59, %v284_v60 }
 0x4b3   :  { %288 = vrot.lane.b32.xlu1 %v286_v61, %s3032_s16 }
 0x4b4   :  { %v387_v63 = vpop.permute.xlu0 %386 }
 0x4b5   :  { %v389_v1 = vmul.f32 %v2709_v62, %v387_v63 }
 0x4b7   :  { %391 = vrot.lane.b32.xlu0 %v389_v1, %s3032_s16 }
 0x525   :  { %v289_v6 = vpop.permute.xlu1 %288 }
 0x526   :  { %v3200_v7 = vadd.f32 %v289_v6, %v281_v2 }
 0x528   :  { %2710 = vtanh.f32 %v3200_v7 }
 0x529   :  { %v392_v10 = vpop.permute.xlu0 %391 }
 0x52a   :  { %v3203_v11 = vadd.f32 %v392_v10, %v384_v8 }
 0x52c   :  { %2712 = vtanh.f32 %v3203_v11 }
 0x535   :  { %v2711_v13 = vpop.eup %2710 }
 0x536   :  { %294 = vrot.lane.b32.xlu1 %v2711_v13, %s3032_s16 }
 0x539   :  { %v2713_v14 = vpop.eup %2712 }
 0x53a   :  { %397 = vrot.lane.b32.xlu0 %v2713_v14, %s3032_s16 }
 0x53e   :  { %408 = vrot.lane.b32.xlu0 %v2148_v15, %s3032_s16 }
 0x5a8   :  { %v295_v19 = vpop.permute.xlu1 %294 }
 0x5a9   :  { %v297_v20 = vmul.f32 %v2707_v59, %v295_v19 }
 0x5ab   :  { %404 = vrot.lane.b32.xlu1 %v297_v20, %s3026_s2 }
 0x5ac   :  { %v398_v21 = vpop.permute.xlu0 %397 }
 0x5ad   :  { %v400_v22 = vmul.f32 %v2709_v62, %v398_v21 }
 0x5af   :  { %v2612_v23 = vpack.i.bf16 %v400_v22, %v297_v20  ;;  %481 = vrot.lane.b32.xlu1 %v400_v22, %s3026_s2 }
 0x5b0   :  { %v409_v24 = vpop.permute.xlu0 %408 }
 0x5b1   :  { %2613 = vrot.lane.b32.xlu0 %v2612_v23, %s3033_s27 }
 0x61d   :  { %v405_v27 = vpop.permute.xlu1 %404 }
 0x61e   :  { %v411_v28 = vsel %vm123_vm2, %v405_v27, %v409_v24 }
 0x61f   :  { %v412_v31 = vpack.c.bf16 %v411_v28, %v411_v28 }
 0x621   :  { %2359 = vmatmul.mubr.msk.bf16.vlgmr.msra.gmra.mxu1 %vm147_vm3, %v412_v31  ;;  %v482_v37 = vpop.permute.xlu1 %481 }
 0x622   :  { %2363 = vmatpush3.bf16.msra.mxu1 %v3145_v25  ;;  %2370 = vmatprep.mubr.msk.bf16.mxu1 %vm3031_vm0, %v3030_v0 }
 0x623   :  { %v2614_v32 = vpop.permute.xlu0 %2613  ;;  %2364 = vmatprep.subr.bf16.mxu1 %v3030_v0 }
 0x624   :  { %v2616_v33 = vunpack.i.h.bf16 %v2614_v32  ;;  %v2615_v36 = vunpack.i.l.bf16 %v2614_v32 }
 0x626   :  { %v559_v34 = vsel %vm123_vm2, 0.0, %v2616_v33  ;;  %2365 = vmatpush3.bf16.msra.mxu1 %v3151_v26  ;;  %v487_v38 = vsel %vm123_vm2, %v482_v37, %v2615_v36 }
 0x627   :  { %v560_v35 = vpack.c.bf16 %v559_v34, %v559_v34  ;;  %2366 = vmatprep.subr.bf16.mxu1 %v3030_v0  ;;  %v488_v39 = vpack.c.bf16 %v487_v38, %v487_v38 }
 0x629   :  { %2383 = vmatmul.mubr.msk.bf16.vlgmr.msra.gmra.mxu0 %vm333_vm4, %v560_v35 }
 0x62a   :  { %2367 = vmatpush3.bf16.msra.mxu1 %v3164_v29  ;;  %2397 = vmatpush3.bf16.msra.mxu0 %v3145_v25 }
 0x62b   :  { %2368 = vmatprep.subr.bf16.mxu1 %v3030_v0  ;;  %2398 = vmatprep.subr.bf16.mxu0 %v3030_v0 }
 0x62c   :  { %2404 = vmatprep.mubr.msk.bf16.mxu0 %vm3031_vm0, %v3030_v0 }
 0x62e   :  { %2369 = vmatpush3.bf16.msra.mxu1 %v3171_v30  ;;  %2399 = vmatpush3.bf16.msra.mxu0 %v3151_v26 }
 0x62f   :  { %2386 = vmatprep.subr.bf16.mxu1 %v3030_v0  ;;  %2400 = vmatprep.subr.bf16.mxu0 %v3030_v0 }
 0x631   :  { %2371 = vmatmul.mubr.msk.bf16.vlgmr.msra.gmra.mxu1 %vm333_vm4, %v488_v39  ;;  %v2160_v39 = vld [vmem:[%s3723_s0 + $0x6] sm:$0x3] }
 0x632   :  { %2387 = vmatpush3.bf16.msra.mxu1 %v3112_v3  ;;  %2392 = vmatprep.mubr.msk.bf16.mxu1 %vm3031_vm0, %v3030_v0 }
 0x633   :  { %2388 = vmatprep.subr.bf16.mxu1 %v3030_v0  ;;  %2401 = vmatpush3.bf16.msra.mxu0 %v3164_v29 }
 0x634   :  { %2402 = vmatprep.subr.bf16.mxu0 %v3030_v0 }
 0x636   :  { %2389 = vmatpush3.bf16.msra.mxu1 %v3115_v4 }
 0x637   :  { %2390 = vmatprep.subr.bf16.mxu1 %v3030_v0  ;;  %2403 = vmatpush3.bf16.msra.mxu0 %v3171_v30 }
 0x638   :  { %2420 = vmatprep.subr.bf16.mxu0 %v3030_v0 }
 0x63a   :  { %2391 = vmatpush3.bf16.msra.mxu1 %v3120_v5 }
 0x63b   :  { %2408 = vmatprep.subr.bf16.mxu1 %v3030_v0 }
 0x6e1   :  { %v450_v40 = vpop.f32.mrf.mxu1 }
 0x6e2   :  { %v451_v41 = vadd.f32 %v3134_v9, %v450_v40 }
 0x6e3   :  { %v2360_v42 = vpop.f32.mrf.mxu1 }
 0x6e4   :  { %2714 = vtanh.f32 %v451_v41  ;;  %v2150_v60 = vmul.f32 -1.442695, %v451_v41 }
 0x6e5   :  { %v453_v44 = vpop.f32.mrf.mxu1 }
 0x6e7   :  { %v2361_v45 = vpop.f32.mrf.mxu1 }
 0x6e9   :  { %v628_v47 = vpop.f32.mrf.mxu0 }
 0x6ea   :  { %v629_v48 = vadd.f32 %v3278_v46, %v628_v47 }
 0x6eb   :  { %v2384_v49 = vpop.f32.mrf.mxu0 }
 0x6ec   :  { %2716 = vtanh.f32 %v629_v48  ;;  %v2159_v61 = vmul.f32 -1.442695, %v629_v48 }
 0x6ed   :  { %v631_v50 = vpop.f32.mrf.mxu0 }
 0x6ef   :  { %v2385_v51 = vpop.f32.mrf.mxu0 }
 0x6f1   :  { %v2715_v52 = vpop.eup %2714  ;;  %v526_v53 = vpop.f32.mrf.mxu1 }
 0x6f2   :  { %v527_v54 = vadd.f32 %v3192_v43, %v526_v53  ;;  %465 = vrot.lane.b32.xlu1 %v2715_v52, %s3032_s16 }
 0x6f3   :  { %v2372_v55 = vpop.f32.mrf.mxu1 }
 0x6f4   :  { %2718 = vtanh.f32 %v527_v54  ;;  %v2152_v62 = vmul.f32 -1.442695, %v527_v54 }
 0x6f5   :  { %v529_v56 = vpop.f32.mrf.mxu1  ;;  %2720 = vpow2.f32 %v2150_v60 }
 0x6f6   :  { %2722 = vpow2.f32 %v2159_v61 }
 0x6f7   :  { %v2373_v57 = vpop.f32.mrf.mxu1  ;;  %2724 = vpow2.f32 %v2152_v62 }
 0x6f9   :  { %v2717_v58 = vpop.eup %2716 }
 0x6fa   :  { %643 = vrot.lane.b32.xlu1 %v2717_v58, %s3032_s16 }
 0x701   :  { %v2719_v59 = vpop.eup %2718 }
 0x702   :  { %541 = vrot.lane.b32.xlu0 %v2719_v59, %s3032_s16  ;;  %v2721_v63 = vpop.eup %2720 }
 0x703   :  { %v459_v1 = vadd.f32 1.0, %v2721_v63  ;;  %v2723_v2 = vpop.eup %2722 }
 0x704   :  { %v637_v6 = vadd.f32 1.0, %v2723_v2  ;;  %v2725_v8 = vpop.eup %2724 }
 0x705   :  { %2726 = vrcp.f32 %v459_v1  ;;  %v535_v10 = vadd.f32 1.0, %v2725_v8 }
 0x706   :  { %2728 = vrcp.f32 %v637_v6 }
 0x707   :  { %2730 = vrcp.f32 %v535_v10 }
 0x712   :  { %v2727_v13 = vpop.eup %2726 }
 0x713   :  { %v2729_v19 = vpop.eup %2728  ;;  %v463_v27 = vmul.f32 %v2727_v13, %v3200_v7 }
 0x714   :  { %v2731_v22 = vpop.eup %2730  ;;  %v641_v32 = vmul.f32 0.0, %v2729_v19 }
 0x715   :  { %v539_v35 = vmul.f32 %v2731_v22, %v3203_v11 }
 0x764   :  { %v466_v14 = vpop.permute.xlu1 %465 }
 0x765   :  { %v468_v15 = vmul.f32 %v2727_v13, %v466_v14 }
 0x767   :  { %470 = vrot.lane.b32.xlu0 %v468_v15, %s3032_s16 }
 0x76c   :  { %v644_v20 = vpop.permute.xlu1 %643 }
 0x76d   :  { %v646_v21 = vmul.f32 %v2729_v19, %v644_v20 }
 0x76f   :  { %648 = vrot.lane.b32.xlu0 %v646_v21, %s3032_s16 }
 0x774   :  { %v542_v23 = vpop.permute.xlu0 %541 }
 0x775   :  { %v544_v24 = vmul.f32 %v2731_v22, %v542_v23 }
 0x777   :  { %546 = vrot.lane.b32.xlu1 %v544_v24, %s3032_s16 }
 0x7d9   :  { %v471_v28 = vpop.permute.xlu0 %470 }
 0x7da   :  { %v3289_v31 = vadd.f32 %v471_v28, %v463_v27 }
 0x7dc   :  { %2732 = vtanh.f32 %v3289_v31 }
 0x7e1   :  { %v649_v33 = vpop.permute.xlu0 %648 }
 0x7e2   :  { %v3292_v34 = vadd.f32 %v649_v33, %v641_v32 }
 0x7e4   :  { %2734 = vtanh.f32 %v3292_v34 }
 0x7e9   :  { %v2733_v36 = vpop.eup %2732  ;;  %v547_v37 = vpop.permute.xlu1 %546 }
 0x7ea   :  { %v3296_v38 = vadd.f32 %v547_v37, %v539_v35  ;;  %476 = vrot.lane.b32.xlu1 %v2733_v36, %s3032_s16 }
 0x7ec   :  { %2736 = vtanh.f32 %v3296_v38 }
 0x7f1   :  { %v2735_v7 = vpop.eup %2734 }
 0x7f2   :  { %654 = vrot.lane.b32.xlu1 %v2735_v7, %s3032_s16 }
 0x7f6   :  { %665 = vrot.lane.b32.xlu1 %v2160_v39, %s3032_s16 }
 0x7f9   :  { %v2737_v40 = vpop.eup %2736 }
 0x7fa   :  { %552 = vrot.lane.b32.xlu0 %v2737_v40, %s3032_s16 }
 0x85c   :  { %v477_v11 = vpop.permute.xlu1 %476 }
 0x85d   :  { %v479_v41 = vmul.f32 %v2727_v13, %v477_v11 }
 0x85f   :  { %661 = vrot.lane.b32.xlu0 %v479_v41, %s3026_s2 }
 0x864   :  { %v655_v42 = vpop.permute.xlu1 %654 }
 0x865   :  { %v657_v45 = vmul.f32 %v2729_v19, %v655_v42 }
 0x868   :  { %v666_v50 = vpop.permute.xlu1 %665 }
 0x86c   :  { %v553_v44 = vpop.permute.xlu0 %552 }
 0x86d   :  { %v555_v47 = vmul.f32 %v2731_v22, %v553_v44 }
 0x86f   :  { %v2622_v48 = vpack.i.bf16 %v555_v47, %v479_v41  ;;  %v2617_v49 = vpack.i.bf16 %v657_v45, %v555_v47 }
 0x871   :  { %2623 = vrot.lane.b32.xlu1 %v2622_v48, %s3033_s27  ;;  %2618 = vrot.lane.b32.xlu0 %v2617_v49, %s3026_s2 }
 0x8d1   :  { %v662_v51 = vpop.permute.xlu0 %661 }
 0x8d2   :  { %v668_v52 = vsel %vm123_vm2, %v662_v51, %v666_v50 }
 0x8d3   :  { %v669_v53 = vpack.c.bf16 %v668_v52, %v668_v52 }
 0x8d5   :  { %2393 = vmatmul.mubr.msk.bf16.vlgmr.msra.gmra.mxu1 %vm147_vm3, %v669_v53 }
 0x8d6   :  { %2409 = vmatpush3.bf16.msra.mxu1 %v3209_v12  ;;  %2416 = vmatprep.mubr.msk.bf16.mxu1 %vm3031_vm0, %v3030_v0 }
 0x8d7   :  { %2410 = vmatprep.subr.bf16.mxu1 %v3030_v0 }
 0x8da   :  { %2411 = vmatpush3.bf16.msra.mxu1 %v3222_v16 }
 0x8db   :  { %2412 = vmatprep.subr.bf16.mxu1 %v3030_v0 }
 0x8de   :  { %2413 = vmatpush3.bf16.msra.mxu1 %v3229_v17 }
 0x8df   :  { %2414 = vmatprep.subr.bf16.mxu1 %v3030_v0 }
 0x8e2   :  { %2415 = vmatpush3.bf16.msra.mxu1 %v3236_v18 }
 0x8e3   :  { %v2619_v54 = vpop.permute.xlu0 %2618  ;;  %v2624_v55 = vpop.permute.xlu1 %2623  ;;  %2430 = vmatprep.subr.bf16.mxu1 %v3030_v0 }
 0x8e4   :  { %v2621_v56 = vunpack.i.h.bf16 %v2619_v54  ;;  %v2620_v57 = vunpack.i.l.bf16 %v2619_v54  ;;  %v2626_v58 = vunpack.i.h.bf16 %v2624_v55  ;;  %v2625_v59 = vunpack.i.l.bf16 %v2624_v55 }
 0x8e6   :  { %v820_v60 = vsel %vm123_vm2, %v2621_v56, %v2626_v58  ;;  %v744_v61 = vsel %vm123_vm2, %v2620_v57, %v2625_v59 }
 0x8e7   :  { %v821_v62 = vpack.c.bf16 %v820_v60, %v820_v60  ;;  %v745_v63 = vpack.c.bf16 %v744_v61, %v744_v61 }
 0x8e9   :  { %2405 = vmatmul.mubr.msk.bf16.vlgmr.msra.gmra.mxu0 %vm333_vm4, %v745_v63  ;;  %2417 = vmatmul.mubr.msk.bf16.vlgmr.msra.gmra.mxu1 %vm333_vm4, %v821_v62 }
 0x8ea   :  { %2421 = vmatpush3.bf16.msra.mxu0 %v3112_v3  ;;  %2426 = vmatprep.mubr.msk.bf16.mxu0 %vm3031_vm0, %v3030_v0 }
 0x8eb   :  { %2422 = vmatprep.subr.bf16.mxu0 %v3030_v0  ;;  %2431 = vmatpush3.bf16.msra.mxu1 %v3145_v25 }
 0x8ec   :  { %2432 = vmatprep.subr.bf16.mxu1 %v3030_v0  ;;  %2438 = vmatprep.mubr.msk.bf16.mxu1 %vm3031_vm0, %v3030_v0 }
 0x8ee   :  { %2423 = vmatpush3.bf16.msra.mxu0 %v3115_v4 }
 0x8ef   :  { %2424 = vmatprep.subr.bf16.mxu0 %v3030_v0  ;;  %2433 = vmatpush3.bf16.msra.mxu1 %v3151_v26 }
 0x8f0   :  { %2434 = vmatprep.subr.bf16.mxu1 %v3030_v0 }
 0x8f2   :  { %2425 = vmatpush3.bf16.msra.mxu0 %v3120_v5 }
 0x8f3   :  { %2442 = vmatprep.subr.bf16.mxu0 %v3030_v0  ;;  %2435 = vmatpush3.bf16.msra.mxu1 %v3164_v29 }
 0x8f4   :  { %2436 = vmatprep.subr.bf16.mxu1 %v3030_v0 }
 0x8f7   :  { %2437 = vmatpush3.bf16.msra.mxu1 %v3171_v30 }
 0x8f8   :  { %2454 = vmatprep.subr.bf16.mxu1 %v3030_v0 }
 0x995   :  { %v707_v1 = vpop.f32.mrf.mxu1 }
 0x996   :  { %v708_v2 = vadd.f32 %v3134_v9, %v707_v1 }
 0x997   :  { %v2394_v6 = vpop.f32.mrf.mxu1 }
 0x998   :  { %2738 = vtanh.f32 %v708_v2  ;;  %v2162_v35 = vmul.f32 -1.442695, %v708_v2 }
 0x999   :  { %v710_v8 = vpop.f32.mrf.mxu1 }
 0x99b   :  { %v2395_v10 = vpop.f32.mrf.mxu1 }
 0x9a5   :  { %v2739_v13 = vpop.eup %2738 }
 0x9a6   :  { %722 = vrot.lane.b32.xlu0 %v2739_v13, %s3032_s16 }
 0x9a9   :  { %v783_v14 = vpop.f32.mrf.mxu0  ;;  %v859_v15 = vpop.f32.mrf.mxu1 }
 0x9aa   :  { %v784_v19 = vadd.f32 %v3192_v43, %v783_v14  ;;  %v860_v20 = vadd.f32 %v3278_v46, %v859_v15 }
 0x9ab   :  { %v2406_v21 = vpop.f32.mrf.mxu0  ;;  %v2418_v22 = vpop.f32.mrf.mxu1 }
 0x9ac   :  { %2740 = vtanh.f32 %v784_v19  ;;  %v2164_v7 = vmul.f32 -1.442695, %v784_v19  ;;  %v2166_v39 = vmul.f32 -1.442695, %v860_v20 }
 0x9ad   :  { %2742 = vtanh.f32 %v860_v20  ;;  %v786_v23 = vpop.f32.mrf.mxu0  ;;  %v862_v24 = vpop.f32.mrf.mxu1 }
 0x9ae   :  { %2744 = vpow2.f32 %v2162_v35 }
 0x9af   :  { %v2407_v27 = vpop.f32.mrf.mxu0  ;;  %v2419_v28 = vpop.f32.mrf.mxu1 }
 0x9b9   :  { %v2741_v32 = vpop.eup %2740 }
 0x9ba   :  { %v2743_v33 = vpop.eup %2742  ;;  %798 = vrot.lane.b32.xlu1 %v2741_v32, %s3032_s16 }
 0x9bb   :  { %874 = vrot.lane.b32.xlu0 %v2743_v33, %s3032_s16  ;;  %v2745_v36 = vpop.eup %2744 }
 0x9bc   :  { %v716_v37 = vadd.f32 1.0, %v2745_v36 }
 0x9be   :  { %2746 = vrcp.f32 %v716_v37 }
 0x9bf   :  { %2748 = vpow2.f32 %v2164_v7 }
 0x9c0   :  { %2750 = vpow2.f32 %v2166_v39 }
 0x9cb   :  { %v2747_v40 = vpop.eup %2746 }
 0x9cc   :  { %v2749_v11 = vpop.eup %2748  ;;  %v720_v54 = vmul.f32 %v2747_v40, %v3289_v31 }
 0x9cd   :  { %v2751_v42 = vpop.eup %2750  ;;  %v792_v45 = vadd.f32 1.0, %v2749_v11 }
 0x9ce   :  { %v868_v47 = vadd.f32 1.0, %v2751_v42 }
 0x9cf   :  { %2752 = vrcp.f32 %v792_v45 }
 0x9d0   :  { %2754 = vrcp.f32 %v868_v47 }
 0x9dc   :  { %v2753_v48 = vpop.eup %2752 }
 0x9dd   :  { %v2755_v50 = vpop.eup %2754  ;;  %v796_v58 = vmul.f32 %v2753_v48, %v3296_v38 }
 0x9de   :  { %v872_v59 = vmul.f32 %v2755_v50, %v3292_v34  ;;  %v2167_v34 = vld [vmem:[%s3723_s0 + $0x8] sm:$0x3] }
 0xa18   :  { %v723_v41 = vpop.permute.xlu0 %722 }
 0xa19   :  { %v725_v44 = vmul.f32 %v2747_v40, %v723_v41 }
 0xa1b   :  { %727 = vrot.lane.b32.xlu1 %v725_v44, %s3032_s16 }
 0xa2c   :  { %v799_v49 = vpop.permute.xlu1 %798 }
 0xa2d   :  { %v875_v51 = vpop.permute.xlu0 %874  ;;  %v801_v52 = vmul.f32 %v2753_v48, %v799_v49 }
 0xa2e   :  { %v877_v53 = vmul.f32 %v2755_v50, %v875_v51 }
 0xa2f   :  { %803 = vrot.lane.b32.xlu0 %v801_v52, %s3032_s16 }
 0xa30   :  { %879 = vrot.lane.b32.xlu1 %v877_v53, %s3032_s16 }
 0xa8d   :  { %v728_v55 = vpop.permute.xlu1 %727 }
 0xa8e   :  { %v3353_v56 = vadd.f32 %v728_v55, %v720_v54 }
 0xa90   :  { %2756 = vtanh.f32 %v3353_v56 }
 0xa9d   :  { %v2757_v57 = vpop.eup %2756 }
 0xa9e   :  { %733 = vrot.lane.b32.xlu0 %v2757_v57, %s3032_s16 }
 0xaa1   :  { %v804_v60 = vpop.permute.xlu0 %803 }
 0xaa2   :  { %v880_v61 = vpop.permute.xlu1 %879  ;;  %v3359_v62 = vadd.f32 %v804_v60, %v796_v58 }
 0xaa3   :  { %v3361_v63 = vadd.f32 %v880_v61, %v872_v59 }
 0xaa4   :  { %2758 = vtanh.f32 %v3359_v62 }
 0xaa5   :  { %2760 = vtanh.f32 %v3361_v63 }
 0xab1   :  { %v2759_v31 = vpop.eup %2758 }
 0xab2   :  { %v2761_v1 = vpop.eup %2760  ;;  %809 = vrot.lane.b32.xlu1 %v2759_v31, %s3032_s16 }
 0xab3   :  { %885 = vrot.lane.b32.xlu0 %v2761_v1, %s3032_s16 }
 0xab7   :  { %896 = vrot.lane.b32.xlu0 %v2167_v34, %s3032_s16 }
 0xb10   :  { %v734_v38 = vpop.permute.xlu0 %733 }
 0xb11   :  { %v736_v2 = vmul.f32 %v2747_v40, %v734_v38 }
 0xb13   :  { %892 = vrot.lane.b32.xlu1 %v736_v2, %s3026_s2 }
 0xb24   :  { %v810_v6 = vpop.permute.xlu1 %809 }
 0xb25   :  { %v886_v8 = vpop.permute.xlu0 %885  ;;  %v812_v10 = vmul.f32 %v2753_v48, %v810_v6 }
 0xb26   :  { %v888_v13 = vmul.f32 %v2755_v50, %v886_v8 }
 0xb27   :  { %v2632_v14 = vpack.i.bf16 %v812_v10, %v736_v2 }
 0xb28   :  { %v2627_v15 = vpack.i.bf16 %v888_v13, %v812_v10 }
 0xb29   :  { %2633 = vrot.lane.b32.xlu0 %v2632_v14, %s3033_s27  ;;  %v897_v19 = vpop.permute.xlu0 %896 }
 0xb2a   :  { %2628 = vrot.lane.b32.xlu1 %v2627_v15, %s3026_s2 }
 0xb85   :  { %v893_v20 = vpop.permute.xlu1 %892 }
 0xb86   :  { %v899_v21 = vsel %vm123_vm2, %v893_v20, %v897_v19 }
 0xb87   :  { %v900_v22 = vpack.c.bf16 %v899_v21, %v899_v21 }
 0xb89   :  { %2427 = vmatmul.mubr.msk.bf16.vlgmr.msra.gmra.mxu0 %vm147_vm3, %v900_v22 }
 0xb8a   :  { %2443 = vmatpush3.bf16.msra.mxu0 %v3209_v12  ;;  %2450 = vmatprep.mubr.msk.bf16.mxu0 %vm3031_vm0, %v3030_v0 }
 0xb8b   :  { %2444 = vmatprep.subr.bf16.mxu0 %v3030_v0 }
 0xb8e   :  { %2445 = vmatpush3.bf16.msra.mxu0 %v3222_v16 }
 0xb8f   :  { %2446 = vmatprep.subr.bf16.mxu0 %v3030_v0 }
 0xb92   :  { %2447 = vmatpush3.bf16.msra.mxu0 %v3229_v17 }
 0xb93   :  { %2448 = vmatprep.subr.bf16.mxu0 %v3030_v0 }
 0xb96   :  { %2449 = vmatpush3.bf16.msra.mxu0 %v3236_v18 }
 0xb97   :  { %2464 = vmatprep.subr.bf16.mxu0 %v3030_v0 }
 0xb9b   :  { %v2634_v23 = vpop.permute.xlu0 %2633 }
 0xb9c   :  { %v2636_v24 = vunpack.i.h.bf16 %v2634_v23  ;;  %v2635_v27 = vunpack.i.l.bf16 %v2634_v23  ;;  %v2629_v28 = vpop.permute.xlu1 %2628 }
 0xb9d   :  { %v2631_v32 = vunpack.i.h.bf16 %v2629_v28  ;;  %v2630_v33 = vunpack.i.l.bf16 %v2629_v28 }
 0xb9f   :  { %v1051_v35 = vsel %vm123_vm2, %v2631_v32, %v2636_v24  ;;  %v975_v36 = vsel %vm123_vm2, %v2630_v33, %v2635_v27 }
 0xba0   :  { %v1052_v37 = vpack.c.bf16 %v1051_v35, %v1051_v35  ;;  %v976_v7 = vpack.c.bf16 %v975_v36, %v975_v36 }
 0xba2   :  { %2439 = vmatmul.mubr.msk.bf16.vlgmr.msra.gmra.mxu1 %vm333_vm4, %v976_v7  ;;  %2451 = vmatmul.mubr.msk.bf16.vlgmr.msra.gmra.mxu0 %vm333_vm4, %v1052_v37 }
 0xba3   :  { %2455 = vmatpush3.bf16.msra.mxu1 %v3112_v3  ;;  %2460 = vmatprep.mubr.msk.bf16.mxu1 %vm3031_vm0, %v3030_v0 }
 0xba4   :  { %2456 = vmatprep.subr.bf16.mxu1 %v3030_v0  ;;  %2465 = vmatpush3.bf16.msra.mxu0 %v3145_v25 }
 0xba5   :  { %2466 = vmatprep.subr.bf16.mxu0 %v3030_v0  ;;  %2472 = vmatprep.mubr.msk.bf16.mxu0 %vm3031_vm0, %v3030_v0 }
 0xba7   :  { %2457 = vmatpush3.bf16.msra.mxu1 %v3115_v4 }
 0xba8   :  { %2458 = vmatprep.subr.bf16.mxu1 %v3030_v0  ;;  %2467 = vmatpush3.bf16.msra.mxu0 %v3151_v26 }
 0xba9   :  { %2468 = vmatprep.subr.bf16.mxu0 %v3030_v0 }
 0xbab   :  { %2459 = vmatpush3.bf16.msra.mxu1 %v3120_v5 }
 0xbac   :  { %2476 = vmatprep.subr.bf16.mxu1 %v3030_v0  ;;  %2469 = vmatpush3.bf16.msra.mxu0 %v3164_v29 }
 0xbad   :  { %2470 = vmatprep.subr.bf16.mxu0 %v3030_v0 }
 0xbb0   :  { %2471 = vmatpush3.bf16.msra.mxu0 %v3171_v30 }
 0xbb1   :  { %2488 = vmatprep.subr.bf16.mxu0 %v3030_v0 }
 0xc49   :  { %v938_v39 = vpop.f32.mrf.mxu0 }
 0xc4a   :  { %v939_v4 = vadd.f32 %v3134_v9, %v938_v39 }
 0xc4b   :  { %v2428_v40 = vpop.f32.mrf.mxu0 }
 0xc4c   :  { %2762 = vtanh.f32 %v939_v4  ;;  %v2169_v55 = vmul.f32 -1.442695, %v939_v4 }
 0xc4d   :  { %v941_v11 = vpop.f32.mrf.mxu0 }
 0xc4f   :  { %v2429_v41 = vpop.f32.mrf.mxu0 }
 0xc59   :  { %v2763_v42 = vpop.eup %2762 }
 0xc5a   :  { %953 = vrot.lane.b32.xlu1 %v2763_v42, %s3032_s16 }
 0xc62   :  { %v1014_v5 = vpop.f32.mrf.mxu1  ;;  %v1090_v44 = vpop.f32.mrf.mxu0 }
 0xc63   :  { %v1015_v45 = vadd.f32 %v3192_v43, %v1014_v5  ;;  %v1091_v47 = vadd.f32 %v3278_v46, %v1090_v44 }
 0xc64   :  { %v2440_v48 = vpop.f32.mrf.mxu1  ;;  %v2452_v49 = vpop.f32.mrf.mxu0 }
 0xc65   :  { %2764 = vtanh.f32 %v1015_v45  ;;  %v2171_v59 = vmul.f32 -1.442695, %v1015_v45  ;;  %v2173_v60 = vmul.f32 -1.442695, %v1091_v47 }
 0xc66   :  { %2766 = vtanh.f32 %v1091_v47  ;;  %v1017_v50 = vpop.f32.mrf.mxu1  ;;  %v1093_v51 = vpop.f32.mrf.mxu0 }
 0xc67   :  { %2768 = vpow2.f32 %v2169_v55 }
 0xc68   :  { %v2441_v9 = vpop.f32.mrf.mxu1  ;;  %v2453_v52 = vpop.f32.mrf.mxu0 }
 0xc72   :  { %v2765_v53 = vpop.eup %2764 }
 0xc73   :  { %v2767_v54 = vpop.eup %2766  ;;  %1029 = vrot.lane.b32.xlu0 %v2765_v53, %s3032_s16 }
 0xc74   :  { %1105 = vrot.lane.b32.xlu1 %v2767_v54, %s3032_s16  ;;  %v2769_v57 = vpop.eup %2768  ;;  %v3477_v54 = vld [vmem:[#allocation5] ss:$0 sm:$0xff] }
 0xc75   :  { %v947_v58 = vadd.f32 1.0, %v2769_v57 }
 0xc77   :  { %2770 = vrcp.f32 %v947_v58 }
 0xc78   :  { %2772 = vpow2.f32 %v2171_v59 }
 0xc79   :  { %2774 = vpow2.f32 %v2173_v60 }
 0xc84   :  { %v2771_v61 = vpop.eup %2770 }
 0xc85   :  { %v2773_v34 = vpop.eup %2772  ;;  %v951_v20 = vmul.f32 %v2771_v61, %v3353_v56 }
 0xc86   :  { %v2775_v38 = vpop.eup %2774  ;;  %v1023_v2 = vadd.f32 1.0, %v2773_v34 }
 0xc87   :  { %v1099_v6 = vadd.f32 1.0, %v2775_v38 }
 0xc88   :  { %2776 = vrcp.f32 %v1023_v2 }
 0xc89   :  { %2778 = vrcp.f32 %v1099_v6 }
 0xc95   :  { %v2777_v8 = vpop.eup %2776 }
 0xc96   :  { %v2779_v13 = vpop.eup %2778  ;;  %v1027_v24 = vmul.f32 %v2777_v8, %v3359_v62  ;;  %v2174_v62 = vld [vmem:[%s3723_s0 + $0xa] sm:$0x3] }
 0xc97   :  { %v1103_v28 = vmul.f32 %v2779_v13, %v3361_v63 }
 0xccc   :  { %v954_v31 = vpop.permute.xlu1 %953 }
 0xccd   :  { %v956_v1 = vmul.f32 %v2771_v61, %v954_v31 }
 0xccf   :  { %958 = vrot.lane.b32.xlu0 %v956_v1, %s3032_s16 }
 0xce5   :  { %v1030_v10 = vpop.permute.xlu0 %1029 }
 0xce6   :  { %v1032_v14 = vmul.f32 %v2777_v8, %v1030_v10  ;;  %v1106_v15 = vpop.permute.xlu1 %1105 }
 0xce7   :  { %v1108_v19 = vmul.f32 %v2779_v13, %v1106_v15 }
 0xce8   :  { %1034 = vrot.lane.b32.xlu1 %v1032_v14, %s3032_s16 }
 0xce9   :  { %1110 = vrot.lane.b32.xlu0 %v1108_v19, %s3032_s16 }
 0xd41   :  { %v959_v21 = vpop.permute.xlu0 %958 }
 0xd42   :  { %v3418_v22 = vadd.f32 %v959_v21, %v951_v20 }
 0xd44   :  { %2780 = vtanh.f32 %v3418_v22 }
 0xd51   :  { %v2781_v23 = vpop.eup %2780 }
 0xd52   :  { %964 = vrot.lane.b32.xlu1 %v2781_v23, %s3032_s16 }
 0xd5a   :  { %v1035_v27 = vpop.permute.xlu1 %1034 }
 0xd5b   :  { %v3424_v32 = vadd.f32 %v1035_v27, %v1027_v24  ;;  %v1111_v33 = vpop.permute.xlu0 %1110 }
 0xd5c   :  { %v3426_v35 = vadd.f32 %v1111_v33, %v1103_v28 }
 0xd5d   :  { %2782 = vtanh.f32 %v3424_v32 }
 0xd5e   :  { %2784 = vtanh.f32 %v3426_v35 }
 0xd6a   :  { %v2783_v56 = vpop.eup %2782 }
 0xd6b   :  { %v2785_v36 = vpop.eup %2784  ;;  %1040 = vrot.lane.b32.xlu0 %v2783_v56, %s3032_s16 }
 0xd6c   :  { %1116 = vrot.lane.b32.xlu1 %v2785_v36, %s3032_s16 }
 0xd70   :  { %1127 = vrot.lane.b32.xlu1 %v2174_v62, %s3032_s16 }
 0xdc4   :  { %v965_v63 = vpop.permute.xlu1 %964 }
 0xdc5   :  { %v967_v37 = vmul.f32 %v2771_v61, %v965_v63 }
 0xdc7   :  { %1123 = vrot.lane.b32.xlu0 %v967_v37, %s3026_s2 }
 0xddd   :  { %v1041_v7 = vpop.permute.xlu0 %1040 }
 0xdde   :  { %v1043_v39 = vmul.f32 %v2777_v8, %v1041_v7  ;;  %v1117_v4 = vpop.permute.xlu1 %1116 }
 0xddf   :  { %v1119_v40 = vmul.f32 %v2779_v13, %v1117_v4 }
 0xde0   :  { %v2642_v11 = vpack.i.bf16 %v1043_v39, %v967_v37 }
 0xde1   :  { %v2637_v41 = vpack.i.bf16 %v1119_v40, %v1043_v39 }
 0xde2   :  { %2643 = vrot.lane.b32.xlu1 %v2642_v11, %s3033_s27  ;;  %v1128_v42 = vpop.permute.xlu1 %1127 }
 0xde3   :  { %2638 = vrot.lane.b32.xlu0 %v2637_v41, %s3026_s2 }
 0xe39   :  { %v1124_v5 = vpop.permute.xlu0 %1123 }
 0xe3a   :  { %v1130_v44 = vsel %vm123_vm2, %v1124_v5, %v1128_v42 }
 0xe3b   :  { %v1131_v45 = vpack.c.bf16 %v1130_v44, %v1130_v44 }
 0xe3d   :  { %2461 = vmatmul.mubr.msk.bf16.vlgmr.msra.gmra.mxu1 %vm147_vm3, %v1131_v45 }
 0xe3e   :  { %2477 = vmatpush3.bf16.msra.mxu1 %v3209_v12  ;;  %2484 = vmatprep.mubr.msk.bf16.mxu1 %vm3031_vm0, %v3030_v0 }
 0xe3f   :  { %2478 = vmatprep.subr.bf16.mxu1 %v3030_v0 }
 0xe42   :  { %2479 = vmatpush3.bf16.msra.mxu1 %v3222_v16 }
 0xe43   :  { %2480 = vmatprep.subr.bf16.mxu1 %v3030_v0 }
 0xe46   :  { %2481 = vmatpush3.bf16.msra.mxu1 %v3229_v17  ;;  %v3463_v17 = vld [vmem:[#allocation2 + $0x8] sm:$0xff]  }
 0xe47   :  { %2482 = vmatprep.subr.bf16.mxu1 %v3030_v0 }
 0xe4a   :  { %2483 = vmatpush3.bf16.msra.mxu1 %v3236_v18  ;;  %v3469_v18 = vld [vmem:[#allocation2] sm:$0xff]  }
 0xe4b   :  { %2498 = vmatprep.subr.bf16.mxu1 %v3030_v0 }
 0xe54   :  { %v2644_v47 = vpop.permute.xlu1 %2643 }
 0xe55   :  { %v2639_v48 = vpop.permute.xlu0 %2638  ;;  %v2646_v12 = vunpack.i.h.bf16 %v2644_v47  ;;  %v2645_v49 = vunpack.i.l.bf16 %v2644_v47 }
 0xe56   :  { %v2641_v50 = vunpack.i.h.bf16 %v2639_v48  ;;  %v2640_v51 = vunpack.i.l.bf16 %v2639_v48 }
 0xe58   :  { %v1282_v9 = vsel %vm123_vm2, %v2641_v50, %v2646_v12  ;;  %v1206_v16 = vsel %vm123_vm2, %v2640_v51, %v2645_v49 }
 0xe59   :  { %v1283_v52 = vpack.c.bf16 %v1282_v9, %v1282_v9  ;;  %v1207_v53 = vpack.c.bf16 %v1206_v16, %v1206_v16 }
 0xe5b   :  { %2473 = vmatmul.mubr.msk.bf16.vlgmr.msra.gmra.mxu0 %vm333_vm4, %v1207_v53  ;;  %2485 = vmatmul.mubr.msk.bf16.vlgmr.msra.gmra.mxu1 %vm333_vm4, %v1283_v52 }
 0xe5c   :  { %2489 = vmatpush3.bf16.msra.mxu0 %v3112_v3  ;;  %2494 = vmatprep.mubr.msk.bf16.mxu0 %vm3031_vm0, %v3030_v0 }
 0xe5d   :  { %2490 = vmatprep.subr.bf16.mxu0 %v3030_v0  ;;  %2499 = vmatpush3.bf16.msra.mxu1 %v3145_v25 }
 0xe5e   :  { %2500 = vmatprep.subr.bf16.mxu1 %v3030_v0  ;;  %2506 = vmatprep.mubr.msk.bf16.mxu1 %vm3031_vm0, %v3030_v0 }
 0xe60   :  { %2491 = vmatpush3.bf16.msra.mxu0 %v3463_v17 }
 0xe61   :  { %2492 = vmatprep.subr.bf16.mxu0 %v3030_v0  ;;  %2501 = vmatpush3.bf16.msra.mxu1 %v3151_v26 }
 0xe62   :  { %2502 = vmatprep.subr.bf16.mxu1 %v3030_v0 }
 0xe64   :  { %2493 = vmatpush3.bf16.msra.mxu0 %v3469_v18 }
 0xe65   :  { %2510 = vmatprep.subr.bf16.mxu0 %v3030_v0  ;;  %2503 = vmatpush3.bf16.msra.mxu1 %v3164_v29 }
 0xe66   :  { %2504 = vmatprep.subr.bf16.mxu1 %v3030_v0 }
 0xe69   :  { %2505 = vmatpush3.bf16.msra.mxu1 %v3171_v30 }
 0xe6a   :  { %2522 = vmatprep.subr.bf16.mxu1 %v3030_v0 }
 0xefd   :  { %v1169_v25 = vpop.f32.mrf.mxu1 }
 0xefe   :  { %v1170_v26 = vadd.f32 %v3477_v54, %v1169_v25 }
 0xeff   :  { %v2462_v55 = vpop.f32.mrf.mxu1 }
 0xf00   :  { %2786 = vtanh.f32 %v1170_v26  ;;  %v2176_v13 = vmul.f32 -1.442695, %v1170_v26 }
 0xf01   :  { %v1172_v57 = vpop.f32.mrf.mxu1 }
 0xf02   :  { %v3515_v57 = vld [vmem:[%s3728_s5 + $0x18] sm:$0xff]  }
 0xf03   :  { %v2463_v58 = vpop.f32.mrf.mxu1 }
 0xf04   :  { %v3524_v58 = vld [vmem:[%s3728_s5 + $0x10] sm:$0xff]  }
 0xf0d   :  { %v2787_v59 = vpop.eup %2786 }
 0xf0e   :  { %1184 = vrot.lane.b32.xlu0 %v2787_v59, %s3032_s16  ;;  %v3531_v59 = vld [vmem:[%s3728_s5 + $0x8] sm:$0xff]  }
 0xf1b   :  { %v1245_v60 = vpop.f32.mrf.mxu0  ;;  %v1321_v29 = vpop.f32.mrf.mxu1 }
 0xf1c   :  { %v1246_v61 = vadd.f32 %v3192_v43, %v1245_v60  ;;  %v1322_v30 = vadd.f32 %v3278_v46, %v1321_v29  ;;  %v3538_v60 = vld [vmem:[%s3728_s5] sm:$0xff]  }
 0xf1d   :  { %v2474_v31 = vpop.f32.mrf.mxu0  ;;  %v2486_v1 = vpop.f32.mrf.mxu1 }
 0xf1e   :  { %2788 = vtanh.f32 %v1246_v61  ;;  %v2178_v15 = vmul.f32 -1.442695, %v1246_v61  ;;  %v2180_v19 = vmul.f32 -1.442695, %v1322_v30 }
 0xf1f   :  { %2790 = vtanh.f32 %v1322_v30  ;;  %v1248_v34 = vpop.f32.mrf.mxu0  ;;  %v1324_v38 = vpop.f32.mrf.mxu1 }
 0xf20   :  { %2792 = vpow2.f32 %v2176_v13  ;;  %v3573_v13 = vld [vmem:[%s3726_s3 + $0x8] sm:$0xff]  }
 0xf21   :  { %v2475_v2 = vpop.f32.mrf.mxu0  ;;  %v2487_v6 = vpop.f32.mrf.mxu1 }
 0xf2b   :  { %v2789_v8 = vpop.eup %2788 }
 0xf2c   :  { %v2791_v10 = vpop.eup %2790  ;;  %1260 = vrot.lane.b32.xlu1 %v2789_v8, %s3032_s16 }
 0xf2d   :  { %1336 = vrot.lane.b32.xlu0 %v2791_v10, %s3032_s16  ;;  %v2793_v14 = vpop.eup %2792  ;;  %v3553_v10 = vld [vmem:[%s3726_s3 + $0x18] sm:$0xff]  }
 0xf2e   :  { %v1178_v43 = vadd.f32 1.0, %v2793_v14 }
 0xf30   :  { %2794 = vrcp.f32 %v1178_v43 }
 0xf31   :  { %2796 = vpow2.f32 %v2178_v15 }
 0xf32   :  { %2798 = vpow2.f32 %v2180_v19 }
 0xf3d   :  { %v2795_v20 = vpop.eup %2794 }
 0xf3e   :  { %v2797_v24 = vpop.eup %2796  ;;  %v1182_v39 = vmul.f32 %v2795_v20, %v3418_v22 }
 0xf3f   :  { %v2799_v27 = vpop.eup %2798  ;;  %v1254_v28 = vadd.f32 1.0, %v2797_v24  ;;  %v3586_v24 = vld [vmem:[#allocation7] ss:$0 sm:$0xff] }
 0xf40   :  { %v1330_v33 = vadd.f32 1.0, %v2799_v27 }
 0xf41   :  { %2800 = vrcp.f32 %v1254_v28 }
 0xf42   :  { %2802 = vrcp.f32 %v1330_v33 }
 0xf4e   :  { %v2801_v56 = vpop.eup %2800 }
 0xf4f   :  { %v2803_v62 = vpop.eup %2802  ;;  %v1258_v41 = vmul.f32 %v2801_v56, %v3424_v32  ;;  %v2181_v32 = vld [vmem:[%s3723_s0 + $0xc] sm:$0x3] }
 0xf50   :  { %v1334_v42 = vmul.f32 %v2803_v62, %v3426_v35 }
 0xf80   :  { %v1185_v21 = vpop.permute.xlu0 %1184 }
 0xf81   :  { %v1187_v23 = vmul.f32 %v2795_v20, %v1185_v21 }
 0xf83   :  { %1189 = vrot.lane.b32.xlu1 %v1187_v23, %s3032_s16 }
 0xf9e   :  { %v1261_v36 = vpop.permute.xlu1 %1260 }
 0xf9f   :  { %v1337_v63 = vpop.permute.xlu0 %1336  ;;  %v1263_v37 = vmul.f32 %v2801_v56, %v1261_v36 }
 0xfa0   :  { %v1339_v7 = vmul.f32 %v2803_v62, %v1337_v63 }
 0xfa1   :  { %1265 = vrot.lane.b32.xlu0 %v1263_v37, %s3032_s16 }
 0xfa2   :  { %1341 = vrot.lane.b32.xlu1 %v1339_v7, %s3032_s16 }
 0xff5   :  { %v1190_v4 = vpop.permute.xlu1 %1189 }
 0xff6   :  { %v3489_v40 = vadd.f32 %v1190_v4, %v1182_v39 }
 0xff8   :  { %2804 = vtanh.f32 %v3489_v40 }
0x1005   :  { %v2805_v11 = vpop.eup %2804 }
0x1006   :  { %1195 = vrot.lane.b32.xlu0 %v2805_v11, %s3032_s16 }
0x1013   :  { %v1266_v5 = vpop.permute.xlu0 %1265 }
0x1014   :  { %v1342_v44 = vpop.permute.xlu1 %1341  ;;  %v3495_v45 = vadd.f32 %v1266_v5, %v1258_v41 }
0x1015   :  { %v3497_v47 = vadd.f32 %v1342_v44, %v1334_v42 }
0x1016   :  { %2806 = vtanh.f32 %v3495_v45 }
0x1017   :  { %2808 = vtanh.f32 %v3497_v47 }
0x1023   :  { %v2807_v22 = vpop.eup %2806 }
0x1024   :  { %v2809_v48 = vpop.eup %2808  ;;  %1271 = vrot.lane.b32.xlu1 %v2807_v22, %s3032_s16 }
0x1025   :  { %1347 = vrot.lane.b32.xlu0 %v2809_v48, %s3032_s16 }
0x1029   :  { %1358 = vrot.lane.b32.xlu0 %v2181_v32, %s3032_s16 }
0x1078   :  { %v1196_v35 = vpop.permute.xlu0 %1195 }
0x1079   :  { %v1198_v12 = vmul.f32 %v2795_v20, %v1196_v35 }
0x107b   :  { %1354 = vrot.lane.b32.xlu1 %v1198_v12, %s3026_s2 }
0x1096   :  { %v1272_v49 = vpop.permute.xlu1 %1271 }
0x1097   :  { %v1348_v50 = vpop.permute.xlu0 %1347  ;;  %v1274_v51 = vmul.f32 %v2801_v56, %v1272_v49 }
0x1098   :  { %v1350_v9 = vmul.f32 %v2803_v62, %v1348_v50 }
0x1099   :  { %v2652_v16 = vpack.i.bf16 %v1274_v51, %v1198_v12 }
0x109a   :  { %v2647_v52 = vpack.i.bf16 %v1350_v9, %v1274_v51 }
0x109b   :  { %2653 = vrot.lane.b32.xlu0 %v2652_v16, %s3033_s27  ;;  %v1359_v53 = vpop.permute.xlu0 %1358 }
0x109c   :  { %2648 = vrot.lane.b32.xlu1 %v2647_v52, %s3026_s2 }
0x10ed   :  { %v1355_v25 = vpop.permute.xlu1 %1354 }
0x10ee   :  { %v1361_v26 = vsel %vm123_vm2, %v1355_v25, %v1359_v53 }
0x10ef   :  { %v1362_v55 = vpack.c.bf16 %v1361_v26, %v1361_v26 }
0x10f1   :  { %2495 = vmatmul.mubr.msk.bf16.vlgmr.msra.gmra.mxu0 %vm147_vm3, %v1362_v55 }
0x10f2   :  { %2511 = vmatpush3.bf16.msra.mxu0 %v3515_v57  ;;  %2518 = vmatprep.mubr.msk.bf16.mxu0 %vm3031_vm0, %v3030_v0 }
0x10f3   :  { %2512 = vmatprep.subr.bf16.mxu0 %v3030_v0 }
0x10f6   :  { %2513 = vmatpush3.bf16.msra.mxu0 %v3524_v58 }
0x10f7   :  { %2514 = vmatprep.subr.bf16.mxu0 %v3030_v0 }
0x10fa   :  { %2515 = vmatpush3.bf16.msra.mxu0 %v3531_v59 }
0x10fb   :  { %2516 = vmatprep.subr.bf16.mxu0 %v3030_v0 }
0x10fe   :  { %2517 = vmatpush3.bf16.msra.mxu0 %v3538_v60 }
0x10ff   :  { %2532 = vmatprep.subr.bf16.mxu0 %v3030_v0 }
0x110d   :  { %v2654_v29 = vpop.permute.xlu0 %2653 }
0x110e   :  { %v2656_v61 = vunpack.i.h.bf16 %v2654_v29  ;;  %v2655_v30 = vunpack.i.l.bf16 %v2654_v29  ;;  %v2649_v31 = vpop.permute.xlu1 %2648 }
0x110f   :  { %v2651_v1 = vunpack.i.h.bf16 %v2649_v31  ;;  %v2650_v34 = vunpack.i.l.bf16 %v2649_v31 }
0x1111   :  { %v1513_v38 = vsel %vm123_vm2, %v2651_v1, %v2656_v61  ;;  %v1437_v2 = vsel %vm123_vm2, %v2650_v34, %v2655_v30 }
0x1112   :  { %v1514_v6 = vpack.c.bf16 %v1513_v38, %v1513_v38  ;;  %v1438_v8 = vpack.c.bf16 %v1437_v2, %v1437_v2 }
0x1114   :  { %2507 = vmatmul.mubr.msk.bf16.vlgmr.msra.gmra.mxu1 %vm333_vm4, %v1438_v8  ;;  %2519 = vmatmul.mubr.msk.bf16.vlgmr.msra.gmra.mxu0 %vm333_vm4, %v1514_v6 }
0x1115   :  { %2523 = vmatpush3.bf16.msra.mxu1 %v3112_v3  ;;  %2528 = vmatprep.mubr.msk.bf16.mxu1 %vm3031_vm0, %v3030_v0  ;;  %v3564_v3 = vld [vmem:[%s3726_s3 + $0x10] sm:$0xff]  }
0x1116   :  { %2524 = vmatprep.subr.bf16.mxu1 %v3030_v0  ;;  %2533 = vmatpush3.bf16.msra.mxu0 %v3553_v10 }
0x1117   :  { %2534 = vmatprep.subr.bf16.mxu0 %v3030_v0  ;;  %2540 = vmatprep.mubr.msk.bf16.mxu0 %vm3031_vm0, %v3030_v0 }
0x1119   :  { %2525 = vmatpush3.bf16.msra.mxu1 %v3463_v17  ;;  %v3580_v17 = vld [vmem:[%s3726_s3] sm:$0xff]  }
0x111a   :  { %2526 = vmatprep.subr.bf16.mxu1 %v3030_v0  ;;  %2535 = vmatpush3.bf16.msra.mxu0 %v3564_v3 }
0x111b   :  { %2536 = vmatprep.subr.bf16.mxu0 %v3030_v0 }
0x111d   :  { %2527 = vmatpush3.bf16.msra.mxu1 %v3469_v18 }
0x111e   :  { %2544 = vmatprep.subr.bf16.mxu1 %v3030_v0  ;;  %2537 = vmatpush3.bf16.msra.mxu0 %v3573_v13 }
0x111f   :  { %2538 = vmatprep.subr.bf16.mxu0 %v3030_v0 }
0x1122   :  { %2539 = vmatpush3.bf16.msra.mxu0 %v3580_v17 }
0x1123   :  { %2556 = vmatprep.subr.bf16.mxu0 %v3030_v0 }
0x11b1   :  { %v1400_v18 = vpop.f32.mrf.mxu0 }
0x11b2   :  { %v1401_v14 = vadd.f32 %v3477_v54, %v1400_v18 }
0x11b3   :  { %v2496_v43 = vpop.f32.mrf.mxu0 }
0x11b4   :  { %2810 = vtanh.f32 %v1401_v14  ;;  %v2183_v4 = vmul.f32 -1.442695, %v1401_v14 }
0x11b5   :  { %v1403_v15 = vpop.f32.mrf.mxu0 }
0x11b7   :  { %v2497_v19 = vpop.f32.mrf.mxu0 }
0x11c1   :  { %v2811_v20 = vpop.eup %2810 }
0x11c2   :  { %1415 = vrot.lane.b32.xlu1 %v2811_v20, %s3032_s16 }
0x11d4   :  { %v1476_v21 = vpop.f32.mrf.mxu1  ;;  %v1552_v23 = vpop.f32.mrf.mxu0 }
0x11d5   :  { %v1477_v27 = vadd.f32 %v3586_v24, %v1476_v21  ;;  %v1553_v28 = vadd.f32 %v3278_v46, %v1552_v23 }
0x11d6   :  { %v2508_v33 = vpop.f32.mrf.mxu1  ;;  %v2520_v56 = vpop.f32.mrf.mxu0 }
0x11d7   :  { %2812 = vtanh.f32 %v1477_v27  ;;  %v2185_v46 = vmul.f32 -1.442695, %v1477_v27  ;;  %v2187_v42 = vmul.f32 -1.442695, %v1553_v28 }
0x11d8   :  { %2814 = vtanh.f32 %v1553_v28  ;;  %v1479_v36 = vpop.f32.mrf.mxu1  ;;  %v1555_v62 = vpop.f32.mrf.mxu0 }
0x11d9   :  { %2816 = vpow2.f32 %v2183_v4 }
0x11da   :  { %v2509_v63 = vpop.f32.mrf.mxu1  ;;  %v2521_v37 = vpop.f32.mrf.mxu0 }
0x11e4   :  { %v2813_v7 = vpop.eup %2812 }
0x11e5   :  { %v2815_v39 = vpop.eup %2814  ;;  %1491 = vrot.lane.b32.xlu0 %v2813_v7, %s3032_s16 }
0x11e6   :  { %1567 = vrot.lane.b32.xlu1 %v2815_v39, %s3032_s16  ;;  %v2817_v11 = vpop.eup %2816 }
0x11e7   :  { %v1409_v41 = vadd.f32 1.0, %v2817_v11 }
0x11e9   :  { %2818 = vrcp.f32 %v1409_v41 }
0x11ea   :  { %2820 = vpow2.f32 %v2185_v46 }
0x11eb   :  { %2822 = vpow2.f32 %v2187_v42 }
0x11f6   :  { %v2819_v5 = vpop.eup %2818 }
0x11f7   :  { %v2821_v48 = vpop.eup %2820  ;;  %v1413_v53 = vmul.f32 %v2819_v5, %v3489_v40 }
0x11f8   :  { %v2823_v32 = vpop.eup %2822  ;;  %v1485_v35 = vadd.f32 1.0, %v2821_v48 }
0x11f9   :  { %v1561_v12 = vadd.f32 1.0, %v2823_v32 }
0x11fa   :  { %2824 = vrcp.f32 %v1485_v35 }
0x11fb   :  { %2826 = vrcp.f32 %v1561_v12 }
0x1207   :  { %v2825_v49 = vpop.eup %2824 }
0x1208   :  { %v2827_v51 = vpop.eup %2826  ;;  %v1489_v29 = vmul.f32 %v2825_v49, %v3495_v45  ;;  %v2188_v45 = vld [vmem:[%s3723_s0 + $0xe] sm:$0x3] }
0x1209   :  { %v1565_v30 = vmul.f32 %v2827_v51, %v3497_v47 }
0x1234   :  { %v1416_v44 = vpop.permute.xlu1 %1415 }
0x1235   :  { %v1418_v22 = vmul.f32 %v2819_v5, %v1416_v44 }
0x1237   :  { %1420 = vrot.lane.b32.xlu0 %v1418_v22, %s3032_s16 }
0x1257   :  { %v1492_v50 = vpop.permute.xlu0 %1491 }
0x1258   :  { %v1494_v9 = vmul.f32 %v2825_v49, %v1492_v50  ;;  %v1568_v16 = vpop.permute.xlu1 %1567 }
0x1259   :  { %v1570_v52 = vmul.f32 %v2827_v51, %v1568_v16 }
0x125a   :  { %1496 = vrot.lane.b32.xlu1 %v1494_v9, %s3032_s16 }
0x125b   :  { %1572 = vrot.lane.b32.xlu0 %v1570_v52, %s3032_s16 }
0x12a9   :  { %v1421_v25 = vpop.permute.xlu0 %1420 }
0x12aa   :  { %v3596_v26 = vadd.f32 %v1421_v25, %v1413_v53 }
0x12ac   :  { %2828 = vtanh.f32 %v3596_v26 }
0x12b9   :  { %v2829_v55 = vpop.eup %2828 }
0x12ba   :  { %1426 = vrot.lane.b32.xlu1 %v2829_v55, %s3032_s16 }
0x12cc   :  { %v1497_v61 = vpop.permute.xlu1 %1496 }
0x12cd   :  { %v3602_v31 = vadd.f32 %v1497_v61, %v1489_v29  ;;  %v1573_v1 = vpop.permute.xlu0 %1572 }
0x12ce   :  { %v3604_v34 = vadd.f32 %v1573_v1, %v1565_v30 }
0x12cf   :  { %2830 = vtanh.f32 %v3602_v31 }
0x12d0   :  { %2832 = vtanh.f32 %v3604_v34 }
0x12dc   :  { %v2831_v40 = vpop.eup %2830 }
0x12dd   :  { %v2833_v38 = vpop.eup %2832  ;;  %1502 = vrot.lane.b32.xlu0 %v2831_v40, %s3032_s16 }
0x12de   :  { %1578 = vrot.lane.b32.xlu1 %v2833_v38, %s3032_s16 }
0x12e2   :  { %1589 = vrot.lane.b32.xlu1 %v2188_v45, %s3032_s16 }
0x132c   :  { %v1427_v47 = vpop.permute.xlu1 %1426 }
0x132d   :  { %v1429_v2 = vmul.f32 %v2819_v5, %v1427_v47  ;;  %v3656_v5 = vld [vmem:[#allocation8] ss:$0 sm:$0xff] }
0x132f   :  { %1585 = vrot.lane.b32.xlu0 %v1429_v2, %s3026_s2 }
0x134f   :  { %v1503_v6 = vpop.permute.xlu0 %1502 }
0x1350   :  { %v1505_v8 = vmul.f32 %v2825_v49, %v1503_v6  ;;  %v1579_v18 = vpop.permute.xlu1 %1578 }
0x1351   :  { %v1581_v14 = vmul.f32 %v2827_v51, %v1579_v18 }
0x1352   :  { %v2662_v43 = vpack.i.bf16 %v1505_v8, %v1429_v2 }
0x1353   :  { %v2657_v15 = vpack.i.bf16 %v1581_v14, %v1505_v8 }
0x1354   :  { %2663 = vrot.lane.b32.xlu1 %v2662_v43, %s3033_s27  ;;  %v1590_v19 = vpop.permute.xlu1 %1589 }
0x1355   :  { %2658 = vrot.lane.b32.xlu0 %v2657_v15, %s3026_s2 }
0x13a1   :  { %v1586_v20 = vpop.permute.xlu0 %1585 }
0x13a2   :  { %v1592_v21 = vsel %vm123_vm2, %v1586_v20, %v1590_v19 }
0x13a3   :  { %v1593_v23 = vpack.c.bf16 %v1592_v21, %v1592_v21 }
0x13a5   :  { %2529 = vmatmul.mubr.msk.bf16.vlgmr.msra.gmra.mxu1 %vm147_vm3, %v1593_v23 }
0x13a6   :  { %2545 = vmatpush3.bf16.msra.mxu1 %v3515_v57  ;;  %2552 = vmatprep.mubr.msk.bf16.mxu1 %vm3031_vm0, %v3030_v0 }
0x13a7   :  { %2546 = vmatprep.subr.bf16.mxu1 %v3030_v0 }
0x13aa   :  { %2547 = vmatpush3.bf16.msra.mxu1 %v3524_v58 }
0x13ab   :  { %2548 = vmatprep.subr.bf16.mxu1 %v3030_v0 }
0x13ae   :  { %2549 = vmatpush3.bf16.msra.mxu1 %v3531_v59 }
0x13af   :  { %2550 = vmatprep.subr.bf16.mxu1 %v3030_v0 }
0x13b2   :  { %2551 = vmatpush3.bf16.msra.mxu1 %v3538_v60 }
0x13b3   :  { %2568 = vmatprep.subr.bf16.mxu1 %v3030_v0 }
0x13c6   :  { %v2664_v27 = vpop.permute.xlu1 %2663 }
0x13c7   :  { %v2659_v28 = vpop.permute.xlu0 %2658  ;;  %v2666_v33 = vunpack.i.h.bf16 %v2664_v27  ;;  %v2665_v56 = vunpack.i.l.bf16 %v2664_v27 }
0x13c8   :  { %v2661_v36 = vunpack.i.h.bf16 %v2659_v28  ;;  %v2660_v62 = vunpack.i.l.bf16 %v2659_v28 }
0x13ca   :  { %v1744_v63 = vsel %vm123_vm2, %v2661_v36, %v2666_v33  ;;  %v1668_v37 = vsel %vm123_vm2, %v2660_v62, %v2665_v56 }
0x13cb   :  { %v1745_v7 = vpack.c.bf16 %v1744_v63, %v1744_v63  ;;  %v1669_v39 = vpack.c.bf16 %v1668_v37, %v1668_v37 }
0x13cd   :  { %2541 = vmatmul.mubr.msk.bf16.vlgmr.msra.gmra.mxu0 %vm333_vm4, %v1669_v39  ;;  %2553 = vmatmul.mubr.msk.bf16.vlgmr.msra.gmra.mxu1 %vm333_vm4, %v1745_v7 }
0x13ce   :  { %2557 = vmatpush3.bf16.msra.mxu0 %v3553_v10  ;;  %2569 = vmatpush3.bf16.msra.mxu1 %v3515_v57 }
0x13cf   :  { %2558 = vmatprep.subr.bf16.mxu0 %v3030_v0  ;;  %2570 = vmatprep.subr.bf16.mxu1 %v3030_v0 }
0x13d0   :  { %2564 = vmatprep.mubr.msk.bf16.mxu0 %vm3031_vm0, %v3030_v0  ;;  %2576 = vmatprep.mubr.msk.bf16.mxu1 %vm3031_vm0, %v3030_v0 }
0x13d2   :  { %2559 = vmatpush3.bf16.msra.mxu0 %v3564_v3  ;;  %2571 = vmatpush3.bf16.msra.mxu1 %v3524_v58 }
0x13d3   :  { %2560 = vmatprep.subr.bf16.mxu0 %v3030_v0  ;;  %2572 = vmatprep.subr.bf16.mxu1 %v3030_v0 }
0x13d6   :  { %2561 = vmatpush3.bf16.msra.mxu0 %v3573_v13  ;;  %2573 = vmatpush3.bf16.msra.mxu1 %v3531_v59 }
0x13d7   :  { %2562 = vmatprep.subr.bf16.mxu0 %v3030_v0  ;;  %2574 = vmatprep.subr.bf16.mxu1 %v3030_v0 }
0x13da   :  { %2563 = vmatpush3.bf16.msra.mxu0 %v3580_v17  ;;  %2575 = vmatpush3.bf16.msra.mxu1 %v3538_v60 }
0x13db   :  { %2580 = vmatprep.subr.bf16.mxu0 %v3030_v0  ;;  %2592 = vmatprep.subr.bf16.mxu1 %v3030_v0 }
0x1465   :  { %v1631_v10 = vpop.f32.mrf.mxu1 }
0x1466   :  { %v1632_v3 = vadd.f32 %v3477_v54, %v1631_v10 }
0x1467   :  { %v2530_v4 = vpop.f32.mrf.mxu1 }
0x1468   :  { %2834 = vtanh.f32 %v1632_v3  ;;  %v2190_v51 = vmul.f32 -1.442695, %v1632_v3 }
0x1469   :  { %v1634_v13 = vpop.f32.mrf.mxu1 }
0x146b   :  { %v2531_v11 = vpop.f32.mrf.mxu1 }
0x1475   :  { %v2835_v41 = vpop.eup %2834 }
0x1476   :  { %1646 = vrot.lane.b32.xlu0 %v2835_v41, %s3032_s16 }
0x148d   :  { %v1707_v46 = vpop.f32.mrf.mxu0  ;;  %v1783_v42 = vpop.f32.mrf.mxu1 }
0x148e   :  { %v1708_v17 = vadd.f32 %v3586_v24, %v1707_v46  ;;  %v1784_v44 = vadd.f32 %v3656_v5, %v1783_v42 }
0x148f   :  { %v2542_v22 = vpop.f32.mrf.mxu0  ;;  %v2554_v48 = vpop.f32.mrf.mxu1 }
0x1490   :  { %2836 = vtanh.f32 %v1708_v17  ;;  %v2192_v55 = vmul.f32 -1.442695, %v1708_v17  ;;  %v2194_v29 = vmul.f32 -1.442695, %v1784_v44 }
0x1491   :  { %2838 = vtanh.f32 %v1784_v44  ;;  %v1710_v54 = vpop.f32.mrf.mxu0  ;;  %v1786_v32 = vpop.f32.mrf.mxu1 }
0x1492   :  { %2840 = vpow2.f32 %v2190_v51 }
0x1493   :  { %v2543_v35 = vpop.f32.mrf.mxu0  ;;  %v2555_v12 = vpop.f32.mrf.mxu1 }
0x149d   :  { %v2837_v49 = vpop.eup %2836 }
0x149e   :  { %v2839_v50 = vpop.eup %2838  ;;  %1722 = vrot.lane.b32.xlu1 %v2837_v49, %s3032_s16 }
0x149f   :  { %1798 = vrot.lane.b32.xlu0 %v2839_v50, %s3032_s16  ;;  %v2841_v9 = vpop.eup %2840 }
0x14a0   :  { %v1640_v16 = vadd.f32 1.0, %v2841_v9 }
0x14a2   :  { %2842 = vrcp.f32 %v1640_v16 }
0x14a3   :  { %2844 = vpow2.f32 %v2192_v55 }
0x14a4   :  { %2846 = vpow2.f32 %v2194_v29 }
0x14af   :  { %v2843_v52 = vpop.eup %2842 }
0x14b0   :  { %v2845_v61 = vpop.eup %2844  ;;  %v1644_v18 = vmul.f32 %v2843_v52, %v3596_v26 }
0x14b1   :  { %v2847_v30 = vpop.eup %2846  ;;  %v1716_v1 = vadd.f32 1.0, %v2845_v61 }
0x14b2   :  { %v1792_v40 = vadd.f32 1.0, %v2847_v30 }
0x14b3   :  { %2848 = vrcp.f32 %v1716_v1 }
0x14b4   :  { %2850 = vrcp.f32 %v1792_v40 }
0x14c0   :  { %v2849_v38 = vpop.eup %2848 }
0x14c1   :  { %v2851_v47 = vpop.eup %2850  ;;  %v1720_v19 = vmul.f32 %v2849_v38, %v3602_v31 }
0x14c2   :  { %v1796_v20 = vmul.f32 %v2851_v47, %v3604_v34 }
0x14e8   :  { %v1647_v53 = vpop.permute.xlu0 %1646 }
0x14e9   :  { %v1649_v25 = vmul.f32 %v2843_v52, %v1647_v53 }
0x14eb   :  { %1651 = vrot.lane.b32.xlu1 %v1649_v25, %s3032_s16 }
0x1510   :  { %v1723_v45 = vpop.permute.xlu1 %1722 }
0x1511   :  { %v1799_v2 = vpop.permute.xlu0 %1798  ;;  %v1725_v6 = vmul.f32 %v2849_v38, %v1723_v45 }
0x1512   :  { %v1801_v8 = vmul.f32 %v2851_v47, %v1799_v2 }
0x1513   :  { %1727 = vrot.lane.b32.xlu0 %v1725_v6, %s3032_s16 }
0x1514   :  { %1803 = vrot.lane.b32.xlu1 %v1801_v8, %s3032_s16 }
0x155d   :  { %v1652_v14 = vpop.permute.xlu1 %1651 }
0x155e   :  { %v1654_v43 = vadd.f32 %v1652_v14, %v1644_v18 }
0x1560   :  { %2852 = vtanh.f32 %v1654_v43 }
0x156d   :  { %v2853_v15 = vpop.eup %2852 }
0x156e   :  { %1657 = vrot.lane.b32.xlu0 %v2853_v15, %s3032_s16 }
0x1585   :  { %v1728_v21 = vpop.permute.xlu0 %1727 }
0x1586   :  { %v1804_v23 = vpop.permute.xlu1 %1803  ;;  %v3668_v27 = vadd.f32 %v1728_v21, %v1720_v19 }
0x1587   :  { %v3670_v28 = vadd.f32 %v1804_v23, %v1796_v20 }
0x1588   :  { %2854 = vtanh.f32 %v3668_v27 }
0x1589   :  { %2856 = vtanh.f32 %v3670_v28 }
0x1595   :  { %v2855_v26 = vpop.eup %2854 }
0x1596   :  { %v2857_v33 = vpop.eup %2856  ;;  %1733 = vrot.lane.b32.xlu1 %v2855_v26, %s3032_s16 }
0x1597   :  { %1809 = vrot.lane.b32.xlu0 %v2857_v33, %s3032_s16 }
0x15e0   :  { %v1658_v56 = vpop.permute.xlu0 %1657 }
0x15e1   :  { %v1660_v36 = vmul.f32 %v2843_v52, %v1658_v56 }
0x1608   :  { %v1734_v31 = vpop.permute.xlu1 %1733 }
0x1609   :  { %v1810_v34 = vpop.permute.xlu0 %1809  ;;  %v1736_v62 = vmul.f32 %v2849_v38, %v1734_v31 }
0x160a   :  { %v1812_v63 = vmul.f32 %v2851_v47, %v1810_v34 }
0x160b   :  { %v2672_v37 = vpack.i.bf16 %v1736_v62, %v1660_v36 }
0x160c   :  { %v2667_v7 = vpack.i.bf16 %v1812_v63, %v1736_v62 }
0x160d   :  { %2673 = vrot.lane.b32.xlu0 %v2672_v37, %s3033_s27 }
0x160e   :  { %2668 = vrot.lane.b32.xlu1 %v2667_v7, %s3026_s2 }
0x167f   :  { %v2674_v39 = vpop.permute.xlu0 %2673 }
0x1680   :  { %v2676_v10 = vunpack.i.h.bf16 %v2674_v39  ;;  %v2675_v3 = vunpack.i.l.bf16 %v2674_v39  ;;  %v2669_v4 = vpop.permute.xlu1 %2668 }
0x1681   :  { %v2671_v13 = vunpack.i.h.bf16 %v2669_v4  ;;  %v2670_v11 = vunpack.i.l.bf16 %v2669_v4  ;;  %v2689_v4 = vld [vmem:[%s3730_s7] sm:$0xff]  }
0x1683   :  { %v1897_v41 = vsel %vm123_vm2, %v2671_v13, %v2676_v10  ;;  %v1821_v46 = vsel %vm123_vm2, %v2670_v11, %v2675_v3  ;;  %v2688_v3 = vld [vmem:[%s3730_s7 + $0x8] sm:$0xff]   ;;  %s2995_s7 = scalar_lea.vmem %s2122_s18, 32 }
0x1684   :  { %v1898_v42 = vpack.c.bf16 %v1897_v41, %v1897_v41  ;;  %v1822_v17 = vpack.c.bf16 %v1821_v46, %v1821_v46  ;;  %p2996_p11 = scmp.ne.s32.totalorder %s2122_s18, %s2995_s7  ;;  %p3001_p13 = scmp.lt.s32.totalorder %s2995_s7, %s2995_s7 }
0x1686   :  { %2565 = vmatmul.mubr.msk.bf16.vlgmr.msra.gmra.mxu0 %vm333_vm4, %v1822_v17  ;;  %2577 = vmatmul.mubr.msk.bf16.vlgmr.msra.gmra.mxu1 %vm333_vm4, %v1898_v42  ;;  %v2201_v17 = vld [vmem:[#allocation10] ss:$0 sm:$0xff]  ;;  %p3002_p0 = por %p3001_p13, %p3000_p12 }
0x1687   :  { %2581 = vmatpush3.bf16.msra.mxu0 %v3515_v57  ;;  %2588 = vmatprep.mubr.msk.bf16.mxu0 %vm3031_vm0, %v3030_v0 }
0x1688   :  { %2582 = vmatprep.subr.bf16.mxu0 %v3030_v0  ;;  %2596 = vmatprep.mubr.msk.bf16.mxu1 %vm3031_vm0, %v3030_v0  ;;  %p3003_p1 = pnand %p3002_p0, %p2996_p11 }
0x1689   :  { %2593 = vmatpush3.bf16.msra.mxu1 %v2688_v3 }
0x168a   :  { %2594 = vmatprep.subr.bf16.mxu1 %v3030_v0 }
0x168b   :  { %2583 = vmatpush3.bf16.msra.mxu0 %v3524_v58 }
0x168c   :  { %2584 = vmatprep.subr.bf16.mxu0 %v3030_v0 }
0x168d   :  { %2595 = vmatpush3.bf16.msra.mxu1 %v2689_v4 }
0x168f   :  { %2585 = vmatpush3.bf16.msra.mxu0 %v3531_v59 }
0x1690   :  { %2586 = vmatprep.subr.bf16.mxu0 %v3030_v0 }
0x1693   :  { %2587 = vmatpush3.bf16.msra.mxu0 %v3538_v60 }
0x1746   :  { %v1860_v44 = vpop.f32.mrf.mxu0  ;;  %v1936_v57 = vpop.f32.mrf.mxu1 }
0x1747   :  { %v1861_v22 = vadd.f32 %v3586_v24, %v1860_v44  ;;  %v1937_v48 = vadd.f32 %v3656_v5, %v1936_v57 }
0x1748   :  { %v2566_v54 = vpop.f32.mrf.mxu0  ;;  %v2578_v32 = vpop.f32.mrf.mxu1 }
0x1749   :  { %2858 = vtanh.f32 %v1861_v22  ;;  %v2196_v60 = vmul.f32 -1.442695, %v1861_v22  ;;  %v2198_v51 = vmul.f32 -1.442695, %v1937_v48 }
0x174a   :  { %2860 = vtanh.f32 %v1937_v48  ;;  %v1863_v35 = vpop.f32.mrf.mxu0  ;;  %v1939_v58 = vpop.f32.mrf.mxu1 }
0x174b   :  { %2862 = vpow2.f32 %v2196_v60 }
0x174c   :  { %v2567_v12 = vpop.f32.mrf.mxu0  ;;  %v2579_v49 = vpop.f32.mrf.mxu1  ;;  %2864 = vpow2.f32 %v2198_v51 }
0x1756   :  { %v2859_v50 = vpop.eup %2858 }
0x1757   :  { %v2861_v59 = vpop.eup %2860  ;;  %1875 = vrot.lane.b32.xlu1 %v2859_v50, %s3032_s16 }
0x1758   :  { %1951 = vrot.lane.b32.xlu0 %v2861_v59, %s3032_s16  ;;  %v2863_v24 = vpop.eup %2862 }
0x1759   :  { %v2865_v9 = vpop.eup %2864  ;;  %v1869_v16 = vadd.f32 1.0, %v2863_v24 }
0x175a   :  { %v1945_v52 = vadd.f32 1.0, %v2865_v9 }
0x175b   :  { %2866 = vrcp.f32 %v1869_v16 }
0x175c   :  { %2868 = vrcp.f32 %v1945_v52 }
0x1768   :  { %v2867_v53 = vpop.eup %2866 }
0x1769   :  { %v2869_v55 = vpop.eup %2868  ;;  %v1873_v1 = vmul.f32 %v2867_v53, %v3668_v27 }
0x176a   :  { %v1949_v40 = vmul.f32 %v2869_v55, %v3670_v28 }
0x17c9   :  { %v1876_v25 = vpop.permute.xlu1 %1875 }
0x17ca   :  { %v1952_v29 = vpop.permute.xlu0 %1951  ;;  %v1878_v61 = vmul.f32 %v2867_v53, %v1876_v25 }
0x17cb   :  { %v1954_v30 = vmul.f32 %v2869_v55, %v1952_v29 }
0x17cc   :  { %1880 = vrot.lane.b32.xlu1 %v1878_v61, %s3032_s16 }
0x17cd   :  { %1956 = vrot.lane.b32.xlu0 %v1954_v30, %s3032_s16 }
0x183e   :  { %v1881_v38 = vpop.permute.xlu1 %1880 }
0x183f   :  { %v1957_v45 = vpop.permute.xlu0 %1956  ;;  %v1883_v47 = vadd.f32 %v1881_v38, %v1873_v1 }
0x1840   :  { %v1959_v2 = vadd.f32 %v1957_v45, %v1949_v40 }
0x1841   :  { %2870 = vtanh.f32 %v1883_v47 }
0x1842   :  { %2872 = vtanh.f32 %v1959_v2 }
0x184e   :  { %v2871_v6 = vpop.eup %2870 }
0x184f   :  { %v2873_v8 = vpop.eup %2872  ;;  %1886 = vrot.lane.b32.xlu1 %v2871_v6, %s3032_s16 }
0x1850   :  { %1962 = vrot.lane.b32.xlu0 %v2873_v8, %s3032_s16 }
0x18c1   :  { %v1887_v18 = vpop.permute.xlu1 %1886 }
0x18c2   :  { %v1963_v14 = vpop.permute.xlu0 %1962  ;;  %v1889_v43 = vmul.f32 %v2867_v53, %v1887_v18 }
0x18c3   :  { %v1965_v15 = vmul.f32 %v2869_v55, %v1963_v14 }
0x18c4   :  { %1971 = vrot.lane.b32.xlu0 %v1889_v43, %s3033_s27 }
0x18c5   :  { %1967 = vrot.lane.b32.xlu1 %v1965_v15, %s3026_s2 }
0x1936   :  { %v1972_v19 = vpop.permute.xlu0 %1971 }
0x1937   :  { %v1968_v20 = vpop.permute.xlu1 %1967 }
0x1938   :  { %v1974_v21 = vsel %vm123_vm2, %v1968_v20, %v1972_v19 }
0x1939   :  { %v1975_v23 = vpack.c.bf16 %v1974_v21, %v1974_v21 }
0x193b   :  { %2589 = vmatmul.mubr.msk.bf16.vlgmr.msra.gmra.mxu0 %vm333_vm4, %v1975_v23 }
0x19fb   :  { %v2013_v27 = vpop.f32.mrf.mxu0 }
0x19fc   :  { %v2014_v28 = vadd.f32 %v3656_v5, %v2013_v27 }
0x19fd   :  { %v2590_v26 = vpop.f32.mrf.mxu0 }
0x19fe   :  { %2874 = vtanh.f32 %v2014_v28  ;;  %v2200_v36 = vmul.f32 -1.442695, %v2014_v28 }
0x19ff   :  { %v2016_v33 = vpop.f32.mrf.mxu0 }
0x1a00   :  { %2876 = vpow2.f32 %v2200_v36 }
0x1a01   :  { %v2591_v56 = vpop.f32.mrf.mxu0 }
0x1a0b   :  { %v2875_v31 = vpop.eup %2874 }
0x1a0c   :  { %2028 = vrot.lane.b32.xlu1 %v2875_v31, %s3032_s16 }
0x1a0d   :  { %v2877_v34 = vpop.eup %2876 }
0x1a0e   :  { %v2022_v62 = vadd.f32 1.0, %v2877_v34 }
0x1a10   :  { %2878 = vrcp.f32 %v2022_v62 }
0x1a1d   :  { %v2879_v63 = vpop.eup %2878 }
0x1a1e   :  { %v2026_v39 = vmul.f32 %v2879_v63, %v1959_v2 }
0x1a7e   :  { %v2029_v37 = vpop.permute.xlu1 %2028 }
0x1a7f   :  { %v2031_v7 = vmul.f32 %v2879_v63, %v2029_v37 }
0x1a81   :  { %2033 = vrot.lane.b32.xlu0 %v2031_v7, %s3032_s16 }
0x1af3   :  { %v2034_v10 = vpop.permute.xlu0 %2033 }
0x1af4   :  { %v2036_v5 = vadd.f32 %v2034_v10, %v2026_v39 }
0x1af6   :  { %2880 = vtanh.f32 %v2036_v5 }
0x1b03   :  { %v2881_v13 = vpop.eup %2880 }
0x1b04   :  { %2039 = vrot.lane.b32.xlu1 %v2881_v13, %s3032_s16 }
0x1b76   :  { %v2040_v11 = vpop.permute.xlu1 %2039 }
0x1b77   :  { %v2042_v41 = vmul.f32 %v2879_v63, %v2040_v11 }
0x1b79   :  { %v2043_v46 = vpack.c.bf16 %v2042_v41, %v2042_v41 }
0x1b7b   :  { %2056 = vrot.lane.b32.xlu0 %v2043_v46, %s3026_s2 }
0x1bed   :  { %v2057_v42 = vpop.permute.xlu0 %2056 }
0x1bee   :  { %2597 = vmatmul.mubr.msk.bf16.vlgmr.msra.gmra.mxu1 %vm123_vm2, %v2057_v42 }
0x1cae   :  { %v2107_v44 = vpop.f32.mrf.mxu1 }
0x1caf   :  { %v2108_v57 = vadd.f32 %v2201_v17, %v2107_v44 }
0x1cb0   :  { %v2598_v0 = vpop.f32.mrf.mxu1 }
0x1cb1   :  { %2114 = vst.msk [vmem:[#allocation11] sm:$0x3] %vm2113_vm5, %v2108_v57 }
0x1cb2   :  { %v2110_v22 = vpop.f32.mrf.mxu1 }
0x1cb3   :  { %3006 = shalt.err (!%p3003_p1)
}
0x1cb4   :  { %2124 = dma.vmem_to_hbm [thread:$0]  %s2122_s18, 32, %s3732_s9, [#allocation4]   ;;  %v2599_v48 = vpop.f32.mrf.mxu1 }
0x1cb5   :  { %3021 = dma.done.wait [#allocation4], 32  }
0x1cb6   :  { %3022 = vsyncadd [#allocation4], 4294967264 }
0x1cb7   :  { %2128 = vsyncpa [#allocation3], 1 }
0x1cb8   :  { %2129 = vsyncpa [#allocation6], 1 }
0x1cb9   :  { %2130 = vsyncpa [#allocation9], 1 }
0x1cba   :  { %2131 = vsyncpa [#allocation4], 1 }

</bundles_post_ra>
